<compile_context>
chip_gen: v7x
topology: tpu7x:2x2x1
jax: 0.10.0
libtpu: 0.0.40
codegen_flags: <defaults>
</compile_context>

<pallas_src>
import math
import jax
import jax.numpy as jnp
from jax.experimental import pallas as pl
from jax.experimental.pallas import tpu as pltpu

IN_FEATURES = 28 * 28   # 784
HIDDEN = 512
OUT_FEATURES = 10
OUT_PAD = 128           # lane-dense output slab (logits live in the first 10 lanes)


def _round_up(x, m):
    return (x + m - 1) // m * m


def _cdiv(a, b):
    return (a + b - 1) // b


def mlp_kernel(x_ref, w1_ref, b1_ref, w2_ref, b2_ref, w3_ref, b3_ref, o_ref):
    # One batch tile per grid step.  Weights/biases use constant index maps +
    # Buffered(1), so they are DMA'd once and stay VMEM-resident while the
    # x / out tiles pipeline.  bf16 operands on the MXU, f32 accumulation.
    x = x_ref[...]
    h1 = (jnp.dot(x, w1_ref[...], preferred_element_type=jnp.float32)
          + b1_ref[...]).astype(jnp.bfloat16)
    h1 = jnp.maximum(h1, 0.0)                       # ReLU on bf16 (commutes with cast)
    h2 = (jnp.dot(h1, w2_ref[...], preferred_element_type=jnp.float32)
          + b2_ref[...]).astype(jnp.bfloat16)
    h2 = jnp.maximum(h2, 0.0)
    logits = (jnp.dot(h2, w3_ref[...], preferred_element_type=jnp.float32)
              + b3_ref[...])
    o_ref[...] = logits.astype(o_ref.dtype)         # (tm, 128) lane-dense bf16 store


def prepare_params(params):
    """Cast weights to bf16 and pad only the tiny output dim to 128 lanes.
    Call ONCE outside the hot path; the returned arrays can be reused across calls."""
    w1, b1, w2, b2, w3, b3 = params
    w1p = w1.astype(jnp.bfloat16)                                       # (784, 512)
    w2p = w2.astype(jnp.bfloat16)                                       # (512, 512)
    w3p = jnp.zeros((HIDDEN, OUT_PAD), jnp.bfloat16).at[:, :OUT_FEATURES].set(
        w3.astype(jnp.bfloat16))                                        # (512, 128)
    b1p = b1.reshape(1, HIDDEN).astype(jnp.float32)
    b2p = b2.reshape(1, HIDDEN).astype(jnp.float32)
    b3p = jnp.zeros((1, OUT_PAD), jnp.float32).at[:, :OUT_FEATURES].set(
        b3.reshape(1, OUT_FEATURES).astype(jnp.float32))
    return w1p, b1p, w2p, b2p, w3p, b3p


# TODO(synk): for serving, keep the ~1.6 MB of bf16 weights VMEM-resident across
# pallas_call invocations (cross-call prefetch / persistent scratch) instead of
# re-DMAing them every call.
def mlp_forward(x, prepared_params, *, batch_tile=512):
    """x: (B, 1, 28, 28) / (B, 28, 28) / (B, 784) -> logits (B, 10) float32.
    batch_tile=512 is safe on all generations; 1024 is fine on v6e/v7x VMEM."""
    B = x.shape[0]
    x2d = x.reshape(B, -1)              # nn.Flatten(start_dim=1) semantics
    assert x2d.shape[1] == IN_FEATURES

    # Batch tiling: pad to a bf16 sublane-pack multiple (16), bound the padding
    # waste, and force >= 2 grid steps when there is enough work so the
    # "parallel" batch axis can shard across the two v7x TensorCores.
    bp0 = _round_up(B, 16)
    n_tiles = max(_cdiv(bp0, batch_tile), 2 if bp0 >= 32 else 1)
    tm = _round_up(_cdiv(bp0, n_tiles), 16)
    bp = tm * n_tiles

    xb = x2d.astype(jnp.bfloat16)
    if bp != B:
        xb = jnp.pad(xb, ((0, bp - B), (0, 0)))     # bounded row pad (< 16*n_tiles)

    w1p, b1p, w2p, b2p, w3p, b3p = prepared_params

    const = lambda i: (0, 0)                        # resident weight/bias blocks
    resident = dict(pipeline_mode=pl.Buffered(1))   # no dead second buffer

    out = pl.pallas_call(
        mlp_kernel,
        out_shape=jax.ShapeDtypeStruct((bp, OUT_PAD), jnp.bfloat16),
        grid_spec=pltpu.PrefetchScalarGridSpec(
            num_scalar_prefetch=0,
            grid=(n_tiles,),
            in_specs=[
                pl.BlockSpec((tm, IN_FEATURES), lambda i: (i, 0)),        # x tile
                pl.BlockSpec((IN_FEATURES, HIDDEN), const, **resident),   # w1
                pl.BlockSpec((1, HIDDEN), const, **resident),             # b1
                pl.BlockSpec((HIDDEN, HIDDEN), const, **resident),        # w2
                pl.BlockSpec((1, HIDDEN), const, **resident),             # b2
                pl.BlockSpec((HIDDEN, OUT_PAD), const, **resident),       # w3
                pl.BlockSpec((1, OUT_PAD), const, **resident),            # b3
            ],
            out_specs=pl.BlockSpec((tm, OUT_PAD), lambda i: (i, 0)),
        ),
        compiler_params=pltpu.CompilerParams(
            dimension_semantics=("parallel",)),     # shard batch tiles across TCs
    )(xb, w1p, b1p, w2p, b2p, w3p, b3p)

    return out[:B, :OUT_FEATURES].astype(jnp.float32)


def init_params(key):
    """Deterministic init mimicking PyTorch nn.Linear default U[-1/sqrt(fan_in), +]."""
    keys = jax.random.split(key, 6)

    def linear(kw, kb, fan_in, fan_out):
        bound = 1.0 / math.sqrt(fan_in)
        w = jax.random.uniform(kw, (fan_in, fan_out), jnp.float32, -bound, bound)
        b = jax.random.uniform(kb, (1, fan_out), jnp.float32, -bound, bound)
        return w, b

    w1, b1 = linear(keys[0], keys[1], IN_FEATURES, HIDDEN)
    w2, b2 = linear(keys[2], keys[3], HIDDEN, HIDDEN)
    w3, b3 = linear(keys[4], keys[5], HIDDEN, OUT_FEATURES)
    return (w1, b1, w2, b2, w3, b3)


def reference(x, params):
    """Pure-JAX reference following the same bf16 cast points, f32 math/accumulation."""
    w1, b1, w2, b2, w3, b3 = params
    B = x.shape[0]
    bf = lambda a: a.astype(jnp.bfloat16).astype(jnp.float32)
    xb = bf(x.reshape(B, -1))
    h = jnp.maximum(xb @ bf(w1) + b1.reshape(1, -1), 0.0)
    h = jnp.maximum(bf(h) @ bf(w2) + b2.reshape(1, -1), 0.0)
    return bf(h) @ bf(w3) + b3.reshape(1, -1)


if __name__ == "__main__":
    key = jax.random.PRNGKey(0)
    k_x, k_p = jax.random.split(key)

    # Small MNIST-like batch: (B, 1, 28, 28), NCHW like PyTorch
    B = 8
    x = jax.random.normal(k_x, (B, 1, 28, 28), dtype=jnp.float32)
    params = init_params(k_p)

    prepared = prepare_params(params)   # one-time weight prep, outside the hot path
    logits = mlp_forward(x, prepared)
    logits = jax.block_until_ready(logits)

    ref = reference(x, params)
    assert logits.shape == (B, OUT_FEATURES)
    assert jnp.allclose(logits, ref, atol=2e-2, rtol=2e-2), (
        float(jnp.max(jnp.abs(logits - ref))))

    print("KERNEL_OK")
</pallas_src>

<mosaic_0001>
module attributes {stable_mosaic.version = 11 : i64} {
  func.func @mlp_kernel(%arg0: i32, %arg1: memref<16x784xbf16, #tpu.memory_space<vmem>>, %arg2: memref<784x512xbf16, #tpu.memory_space<vmem>>, %arg3: memref<1x512xf32, #tpu.memory_space<vmem>>, %arg4: memref<512x512xbf16, #tpu.memory_space<vmem>>, %arg5: memref<1x512xf32, #tpu.memory_space<vmem>>, %arg6: memref<512x128xbf16, #tpu.memory_space<vmem>>, %arg7: memref<1x128xf32, #tpu.memory_space<vmem>>, %arg8: memref<16x128xbf16, #tpu.memory_space<vmem>>) attributes {dimension_semantics = [#tpu.dimension_semantics<parallel>], iteration_bounds = array<i64: 1>, scalar_prefetch = 0 : i64, scratch_operands = 0 : i64, tpu.core_type = #tpu.core_type<tc>, window_params = [{transform_indices = @transform_0, window_bounds = array<i64: 16, 784>}, {pipeline_mode = #tpu.pipeline_mode<synchronous>, transform_indices = @transform_1, window_bounds = array<i64: 784, 512>}, {pipeline_mode = #tpu.pipeline_mode<synchronous>, transform_indices = @transform_2, window_bounds = array<i64: 1, 512>}, {pipeline_mode = #tpu.pipeline_mode<synchronous>, transform_indices = @transform_3, window_bounds = array<i64: 512, 512>}, {pipeline_mode = #tpu.pipeline_mode<synchronous>, transform_indices = @transform_4, window_bounds = array<i64: 1, 512>}, {pipeline_mode = #tpu.pipeline_mode<synchronous>, transform_indices = @transform_5, window_bounds = array<i64: 512, 128>}, {pipeline_mode = #tpu.pipeline_mode<synchronous>, transform_indices = @transform_6, window_bounds = array<i64: 1, 128>}, {transform_indices = @transform_7, window_bounds = array<i64: 16, 128>}]} {
    %c0 = arith.constant 0 : index
    %c0_0 = arith.constant 0 : index
    %0 = vector.load %arg1[%c0, %c0_0] : memref<16x784xbf16, #tpu.memory_space<vmem>>, vector<16x784xbf16>
    %c0_1 = arith.constant 0 : index
    %c0_2 = arith.constant 0 : index
    %1 = vector.load %arg2[%c0_1, %c0_2] : memref<784x512xbf16, #tpu.memory_space<vmem>>, vector<784x512xbf16>
    %cst = arith.constant dense<0.000000e+00> : vector<16x512xf32>
    %2 = tpu.matmul %0, %1, %cst {dimension_numbers = #tpu.dot_dimension_numbers<[1], [0], [0], [1], [0, 0, 1, 1], [], []>} : vector<16x784xbf16>, vector<784x512xbf16>, vector<16x512xf32> -> vector<16x512xf32>
    %c0_3 = arith.constant 0 : index
    %c0_4 = arith.constant 0 : index
    %3 = vector.load %arg3[%c0_3, %c0_4] : memref<1x512xf32, #tpu.memory_space<vmem>>, vector<1x512xf32>
    %4 = vector.broadcast %3 : vector<1x512xf32> to vector<16x512xf32>
    %5 = arith.addf %2, %4 : vector<16x512xf32>
    %6 = arith.truncf %5 : vector<16x512xf32> to vector<16x512xbf16>
    %cst_5 = arith.constant 0.000000e+00 : bf16
    %7 = vector.broadcast %cst_5 : bf16 to vector<16x512xbf16>
    %8 = arith.maximumf %6, %7 : vector<16x512xbf16>
    %c0_6 = arith.constant 0 : index
    %c0_7 = arith.constant 0 : index
    %9 = vector.load %arg4[%c0_6, %c0_7] : memref<512x512xbf16, #tpu.memory_space<vmem>>, vector<512x512xbf16>
    %cst_8 = arith.constant dense<0.000000e+00> : vector<16x512xf32>
    %10 = tpu.matmul %8, %9, %cst_8 {dimension_numbers = #tpu.dot_dimension_numbers<[1], [0], [0], [1], [0, 0, 1, 1], [], []>} : vector<16x512xbf16>, vector<512x512xbf16>, vector<16x512xf32> -> vector<16x512xf32>
    %c0_9 = arith.constant 0 : index
    %c0_10 = arith.constant 0 : index
    %11 = vector.load %arg5[%c0_9, %c0_10] : memref<1x512xf32, #tpu.memory_space<vmem>>, vector<1x512xf32>
    %12 = vector.broadcast %11 : vector<1x512xf32> to vector<16x512xf32>
    %13 = arith.addf %10, %12 : vector<16x512xf32>
    %14 = arith.truncf %13 : vector<16x512xf32> to vector<16x512xbf16>
    %cst_11 = arith.constant 0.000000e+00 : bf16
    %15 = vector.broadcast %cst_11 : bf16 to vector<16x512xbf16>
    %16 = arith.maximumf %14, %15 : vector<16x512xbf16>
    %c0_12 = arith.constant 0 : index
    %c0_13 = arith.constant 0 : index
    %17 = vector.load %arg6[%c0_12, %c0_13] : memref<512x128xbf16, #tpu.memory_space<vmem>>, vector<512x128xbf16>
    %cst_14 = arith.constant dense<0.000000e+00> : vector<16x128xf32>
    %18 = tpu.matmul %16, %17, %cst_14 {dimension_numbers = #tpu.dot_dimension_numbers<[1], [0], [0], [1], [0, 0, 1, 1], [], []>} : vector<16x512xbf16>, vector<512x128xbf16>, vector<16x128xf32> -> vector<16x128xf32>
    %c0_15 = arith.constant 0 : index
    %c0_16 = arith.constant 0 : index
    %19 = vector.load %arg7[%c0_15, %c0_16] : memref<1x128xf32, #tpu.memory_space<vmem>>, vector<1x128xf32>
    %20 = vector.broadcast %19 : vector<1x128xf32> to vector<16x128xf32>
    %21 = arith.addf %18, %20 : vector<16x128xf32>
    %22 = arith.truncf %21 : vector<16x128xf32> to vector<16x128xbf16>
    %c0_17 = arith.constant 0 : index
    %c0_18 = arith.constant 0 : index
    %23 = vector.load %arg8[%c0_17, %c0_18] : memref<16x128xbf16, #tpu.memory_space<vmem>>, vector<16x128xbf16>
    tpu.vector_store %arg8[%c0_17, %c0_18], %22 {strides = array<i32>} : memref<16x128xbf16, #tpu.memory_space<vmem>>, vector<16x128xbf16>,
    return
  }
  func.func @transform_0(%arg0: i32) -> (i32, i32) {
    %c0_i32 = arith.constant 0 : i32
    %c0_i32_0 = arith.constant 0 : i32
    return %arg0, %c0_i32 : i32, i32
  }
  func.func @transform_1(%arg0: i32) -> (i32, i32) {
    %c0_i32 = arith.constant 0 : i32
    %c0_i32_0 = arith.constant 0 : i32
    %c0_i32_1 = arith.constant 0 : i32
    return %c0_i32, %c0_i32_0 : i32, i32
  }
  func.func @transform_2(%arg0: i32) -> (i32, i32) {
    %c0_i32 = arith.constant 0 : i32
    %c0_i32_0 = arith.constant 0 : i32
    %c0_i32_1 = arith.constant 0 : i32
    return %c0_i32, %c0_i32_0 : i32, i32
  }
  func.func @transform_3(%arg0: i32) -> (i32, i32) {
    %c0_i32 = arith.constant 0 : i32
    %c0_i32_0 = arith.constant 0 : i32
    %c0_i32_1 = arith.constant 0 : i32
    return %c0_i32, %c0_i32_0 : i32, i32
  }
  func.func @transform_4(%arg0: i32) -> (i32, i32) {
    %c0_i32 = arith.constant 0 : i32
    %c0_i32_0 = arith.constant 0 : i32
    %c0_i32_1 = arith.constant 0 : i32
    return %c0_i32, %c0_i32_0 : i32, i32
  }
  func.func @transform_5(%arg0: i32) -> (i32, i32) {
    %c0_i32 = arith.constant 0 : i32
    %c0_i32_0 = arith.constant 0 : i32
    %c0_i32_1 = arith.constant 0 : i32
    return %c0_i32, %c0_i32_0 : i32, i32
  }
  func.func @transform_6(%arg0: i32) -> (i32, i32) {
    %c0_i32 = arith.constant 0 : i32
    %c0_i32_0 = arith.constant 0 : i32
    %c0_i32_1 = arith.constant 0 : i32
    return %c0_i32, %c0_i32_0 : i32, i32
  }
  func.func @transform_7(%arg0: i32) -> (i32, i32) {
    %c0_i32 = arith.constant 0 : i32
    %c0_i32_0 = arith.constant 0 : i32
    return %arg0, %c0_i32 : i32, i32
  }
}

</mosaic_0001>

<bundles_post_ra>
// kernel: tpu_custom_call.1
= control target key start
LH: loop header
LB: loop body
LE: loop exit
PB: predicated region body
PF: predicated region fallthrough
CT: control target
= control target key end

     0   :  { %12 = vsyncpa [#allocation3], 0  ;;  %s4330_s0 = inlined_call_operand.hbm [shape: bf16[16,784], index: 0, kind: input, shape index: {}]   ;;  %s4331_s1 = inlined_call_operand.hbm [shape: bf16[784,512], index: 1, kind: input, shape index: {}]   ;;  %s4332_s2 = inlined_call_operand.vmem [shape: f32[1,512], index: 2, kind: input, shape index: {}]   ;;  %s4333_s3 = inlined_call_operand.hbm [shape: bf16[512,512], index: 3, kind: input, shape index: {}]   ;;  %s4334_s4 = inlined_call_operand.vmem [shape: f32[1,512], index: 4, kind: input, shape index: {}]   ;;  %s4335_s5 = inlined_call_operand.hbm [shape: bf16[512,128], index: 5, kind: input, shape index: {}]   ;;  %s4336_s6 = inlined_call_operand.vmem [shape: f32[1,128], index: 6, kind: input, shape index: {}]   ;;  %s4337_s7 = inlined_call_operand.hbm [shape: bf16[16,128], index: 7, kind: output, shape index: {}]  }
   0x1   :  { %13 = vsyncpa [#allocation6], 0 }
   0x2   :  { %14 = vsyncpa [#allocation9], 0 }
   0x3   :  { %15 = vsyncpa [#allocation4], 0  ;;  %s4149_s24 = smov [#allocation5]   ;;  %s4031_s28 = scalar_lea.hbm %s4331_s1, 25088 }
   0x4   :  { %s33_s25 = sshll.u32 %s4149_s24, 4  ;;  %p4032_p0 = scmp.ne.s32.totalorder %s4331_s1, %s4031_s28  ;;  %s34_s25 = int_to_ptr.vmem [resolvable:$true] %s33_s25 }
   0x5   :  { %p4035_p1 = scmp.lt.u32.totalorder %s4031_s28, %s4331_s1 }
   0x7   :  { %p4037_p2 = pnand %p4035_p1, %p4032_p0 }
   0x9   :  { %4040 = shalt.err (!%p4037_p2)
}
   0xa   :  { %s4041_s10 = scalar_lea.vmem %s34_s25, 25088  ;;  %p4046_p4 = scmp.lt.s32.totalorder %s34_s25, %s34_s25 }
   0xb   :  { %p4042_p3 = scmp.ne.s32.totalorder %s34_s25, %s4041_s10  ;;  %p4047_p5 = scmp.lt.s32.totalorder %s4041_s10, %s4041_s10 }
   0xd   :  { %p4048_p6 = por %p4047_p5, %p4046_p4 }
   0xf   :  { %p4049_p7 = pnand %p4048_p6, %p4042_p3 }
  0x11   :  { %4052 = shalt.err (!%p4049_p7)
}
  0x12   :  { %s4150_s11 = smov 256   ;;  %s4151_s12 = smov 16  }
  0x13   :  { %39 = dma.hbm_to_vmem [thread:$0]  %s4331_s1, 25088, %s34_s25, [#allocation6], %s4150_s11, %s4150_s11, %s4151_s12  }
  0x14   :  { %s4152_s15 = smov [#allocation2]   ;;  %s4053_s19 = scalar_lea.hbm %s4330_s0, 896 }
  0x15   :  { %s21_s16 = sshll.u32 %s4152_s15, 4  ;;  %p4054_p8 = scmp.ne.s32.totalorder %s4330_s0, %s4053_s19  ;;  %s22_s16 = int_to_ptr.vmem [resolvable:$true] %s21_s16 }
  0x16   :  { %p4057_p9 = scmp.lt.u32.totalorder %s4053_s19, %s4330_s0 }
  0x18   :  { %p4059_p10 = pnand %p4057_p9, %p4054_p8 }
  0x1a   :  { %4062 = shalt.err (!%p4059_p10)
}
  0x1b   :  { %s4063_s24 = scalar_lea.vmem %s22_s16, 896  ;;  %p4068_p12 = scmp.lt.s32.totalorder %s22_s16, %s22_s16 }
  0x1c   :  { %p4064_p11 = scmp.ne.s32.totalorder %s22_s16, %s4063_s24  ;;  %p4069_p13 = scmp.lt.s32.totalorder %s4063_s24, %s4063_s24 }
  0x1e   :  { %p4070_p0 = por %p4069_p13, %p4068_p12 }
  0x20   :  { %p4071_p1 = pnand %p4070_p0, %p4064_p11 }
  0x22   :  { %4074 = shalt.err (!%p4071_p1)
}
  0x23   :  { %s4153_s1 = smov 448   ;;  %s4154_s25 = smov 28  }
  0x24   :  { %27 = dma.hbm_to_vmem [thread:$0]  %s4330_s0, 896, %s22_s16, [#allocation3], %s4153_s1, %s4153_s1, %s4154_s25  }
  0x25   :  { %s4155_s28 = smov [#allocation7]   ;;  %s4156_s30 = smov [#allocation8]  }
  0x26   :  { %s47_s29 = sshll.u32 %s4155_s28, 4  ;;  %s61_s8 = sshll.u32 %s4156_s30, 4  ;;  %s48_s29 = int_to_ptr.vmem [resolvable:$true] %s47_s29  ;;  %s4228_s8 = int_to_ptr.vmem [resolvable:$true] %s61_s8 }
  0x27   :  { %s4075_s13 = scalar_lea.hbm %s4333_s3, 16384 }
  0x28   :  { %p4076_p2 = scmp.ne.s32.totalorder %s4333_s3, %s4075_s13  ;;  %p4079_p3 = scmp.lt.u32.totalorder %s4075_s13, %s4333_s3 }
  0x2a   :  { %p4081_p4 = pnand %p4079_p3, %p4076_p2 }
  0x2c   :  { %4084 = shalt.err (!%p4081_p4)
}
  0x2d   :  { %s4085_s0 = scalar_lea.vmem %s48_s29, 16384  ;;  %p4090_p6 = scmp.lt.s32.totalorder %s48_s29, %s48_s29 }
  0x2e   :  { %p4086_p5 = scmp.ne.s32.totalorder %s48_s29, %s4085_s0  ;;  %p4091_p7 = scmp.lt.s32.totalorder %s4085_s0, %s4085_s0 }
  0x30   :  { %p4092_p8 = por %p4091_p7, %p4090_p6 }
  0x32   :  { %p4093_p9 = pnand %p4092_p8, %p4086_p5 }
  0x34   :  { %4096 = shalt.err (!%p4093_p9)
}
  0x35   :  { %53 = dma.hbm_to_vmem [thread:$0]  %s4333_s3, 16384, %s48_s29, [#allocation6], %s4150_s11, %s4150_s11, %s4151_s12  }
  0x36   :  { %s4097_s22 = scalar_lea.hbm %s4335_s5, 4096 }
  0x37   :  { %p4098_p10 = scmp.ne.s32.totalorder %s4335_s5, %s4097_s22  ;;  %p4101_p11 = scmp.lt.u32.totalorder %s4097_s22, %s4335_s5 }
  0x39   :  { %p4103_p12 = pnand %p4101_p11, %p4098_p10 }
  0x3b   :  { %4106 = shalt.err (!%p4103_p12)
}
  0x3c   :  { %s4107_s26 = scalar_lea.vmem %s4228_s8, 4096  ;;  %p4112_p0 = scmp.lt.s32.totalorder %s4228_s8, %s4228_s8 }
  0x3d   :  { %p4108_p13 = scmp.ne.s32.totalorder %s4228_s8, %s4107_s26  ;;  %p4113_p1 = scmp.lt.s32.totalorder %s4107_s26, %s4107_s26 }
  0x3f   :  { %p4114_p2 = por %p4113_p1, %p4112_p0 }
  0x41   :  { %p4115_p3 = pnand %p4114_p2, %p4108_p13 }
  0x43   :  { %4118 = shalt.err (!%p4115_p3)
}
  0x44   :  { %s4157_s3 = smov 64   ;;  %s4158_s11 = smov 4  }
  0x45   :  { %67 = dma.hbm_to_vmem [thread:$0]  %s4335_s5, 4096, %s4228_s8, [#allocation9], %s4157_s3, %s4157_s3, %s4158_s11  }
  0x46   :  { %4141 = dma.done.wait [#allocation3], 896  }
  0x47   :  { %4142 = vsyncadd [#allocation3], 4294966400 }
  0x48   :  { %4143 = dma.done.wait [#allocation6], 41472  }
  0x49   :  { %4144 = vsyncadd [#allocation6], 4294925824 }
  0x4a   :  { %4145 = dma.done.wait [#allocation9], 4096  }
  0x4b   :  { %4146 = vsyncadd [#allocation9], 4294963200  ;;  %v3503_v0 = vld [vmem:[#allocation5 + $0x4] ss:$16 sps:$4 sm:$0xff]   ;;  %v3505_v1 = vld [vmem:[#allocation5 + $0xc] ss:$16 sps:$4 sm:$0xff]  }
  0x4c   :  { %1328 = vmatprep.subr.bf16.mxu0 %v3503_v0  ;;  %v3507_v2 = vld [vmem:[#allocation5] ss:$16 sps:$4 sm:$0xff]   ;;  %v3508_v3 = vld [vmem:[#allocation5 + $0x8] ss:$16 sps:$4 sm:$0xff]   ;;  %1500 = vmatprep.subr.bf16.mxu1 %v3505_v1  ;;  %v3509_v4 = vld [vmem:[#allocation5 + $0x24] ss:$16 sps:$4 sm:$0xff]  }
  0x4d   :  { %1329 = vmatpush1.bf16.msra.mxu0 %v3507_v2  ;;  %1501 = vmatpush1.bf16.msra.mxu1 %v3508_v3  ;;  %v3511_v5 = vld [vmem:[#allocation5 + $0x2c] ss:$16 sps:$4 sm:$0xff]   ;;  %v3513_v6 = vld [vmem:[#allocation5 + $0x20] ss:$16 sps:$4 sm:$0xff]   ;;  %v3514_v7 = vld [vmem:[#allocation5 + $0x28] ss:$16 sps:$4 sm:$0xff]  }
  0x4e   :  { %1330 = vmatprep.subr.bf16.mxu0 %v3509_v4  ;;  %1502 = vmatprep.subr.bf16.mxu1 %v3511_v5  ;;  %v3515_v8 = vld [vmem:[#allocation5 + $0x44] ss:$16 sps:$4 sm:$0xff]   ;;  %v3517_v9 = vld [vmem:[#allocation5 + $0x4c] ss:$16 sps:$4 sm:$0xff]   ;;  %v3519_v10 = vld [vmem:[#allocation5 + $0x40] ss:$16 sps:$4 sm:$0xff]  }
  0x4f   :  { %v3520_v11 = vld [vmem:[#allocation5 + $0x48] ss:$16 sps:$4 sm:$0xff]   ;;  %v3521_v12 = vld [vmem:[#allocation5 + $0x64] ss:$16 sps:$4 sm:$0xff]   ;;  %v3523_v13 = vld [vmem:[#allocation5 + $0x6c] ss:$16 sps:$4 sm:$0xff]  }
  0x50   :  { %v3525_v14 = vld [vmem:[#allocation5 + $0x60] ss:$16 sps:$4 sm:$0xff]   ;;  %v3526_v15 = vld [vmem:[#allocation5 + $0x68] ss:$16 sps:$4 sm:$0xff]   ;;  %v3527_v16 = vld [vmem:[#allocation5 + $0x84] ss:$16 sps:$4 sm:$0xff]  }
  0x51   :  { %1331 = vmatpush1.bf16.msra.mxu0 %v3513_v6  ;;  %1503 = vmatpush1.bf16.msra.mxu1 %v3514_v7  ;;  %v3529_v17 = vld [vmem:[#allocation5 + $0x8c] ss:$16 sps:$4 sm:$0xff]   ;;  %v3531_v18 = vld [vmem:[#allocation5 + $0x80] ss:$16 sps:$4 sm:$0xff]   ;;  %v3532_v19 = vld [vmem:[#allocation5 + $0x88] ss:$16 sps:$4 sm:$0xff]  }
  0x52   :  { %1332 = vmatprep.subr.bf16.mxu0 %v3515_v8  ;;  %1504 = vmatprep.subr.bf16.mxu1 %v3517_v9  ;;  %v3533_v20 = vld [vmem:[#allocation5 + $0xa4] ss:$16 sps:$4 sm:$0xff]   ;;  %v3535_v21 = vld [vmem:[#allocation5 + $0xac] ss:$16 sps:$4 sm:$0xff]   ;;  %v3537_v22 = vld [vmem:[#allocation5 + $0xa0] ss:$16 sps:$4 sm:$0xff]  }
  0x53   :  { %v3538_v23 = vld [vmem:[#allocation5 + $0xa8] ss:$16 sps:$4 sm:$0xff]   ;;  %v3539_v24 = vld [vmem:[#allocation5 + $0xc4] ss:$16 sps:$4 sm:$0xff]   ;;  %v3541_v25 = vld [vmem:[#allocation5 + $0xcc] ss:$16 sps:$4 sm:$0xff]  }
  0x54   :  { %v3543_v26 = vld [vmem:[#allocation5 + $0xc0] ss:$16 sps:$4 sm:$0xff]   ;;  %v3544_v27 = vld [vmem:[#allocation5 + $0xc8] ss:$16 sps:$4 sm:$0xff]   ;;  %v3545_v28 = vld [vmem:[#allocation5 + $0xe4] ss:$16 sps:$4 sm:$0xff]  }
  0x55   :  { %1333 = vmatpush1.bf16.msra.mxu0 %v3519_v10  ;;  %1505 = vmatpush1.bf16.msra.mxu1 %v3520_v11  ;;  %v3547_v29 = vld [vmem:[#allocation5 + $0xec] ss:$16 sps:$4 sm:$0xff]   ;;  %v3549_v30 = vld [vmem:[#allocation5 + $0xe0] ss:$16 sps:$4 sm:$0xff]   ;;  %v3550_v31 = vld [vmem:[#allocation5 + $0xe8] ss:$16 sps:$4 sm:$0xff]  }
  0x56   :  { %1334 = vmatprep.subr.bf16.mxu0 %v3521_v12  ;;  %1506 = vmatprep.subr.bf16.mxu1 %v3523_v13  ;;  %v3551_v32 = vld [vmem:[#allocation5 + $0x104] ss:$16 sps:$4 sm:$0xff]   ;;  %v3553_v33 = vld [vmem:[#allocation5 + $0x10c] ss:$16 sps:$4 sm:$0xff]   ;;  %v3555_v34 = vld [vmem:[#allocation5 + $0x100] ss:$16 sps:$4 sm:$0xff]  }
  0x57   :  { %v3556_v35 = vld [vmem:[#allocation5 + $0x108] ss:$16 sps:$4 sm:$0xff]   ;;  %v3557_v36 = vld [vmem:[#allocation5 + $0x124] ss:$16 sps:$4 sm:$0xff]   ;;  %v3559_v37 = vld [vmem:[#allocation5 + $0x12c] ss:$16 sps:$4 sm:$0xff]  }
  0x58   :  { %v3561_v38 = vld [vmem:[#allocation5 + $0x120] ss:$16 sps:$4 sm:$0xff]   ;;  %v3562_v39 = vld [vmem:[#allocation5 + $0x128] ss:$16 sps:$4 sm:$0xff]   ;;  %v3563_v40 = vld [vmem:[#allocation5 + $0x144] ss:$16 sps:$4 sm:$0xff]  }
  0x59   :  { %1335 = vmatpush1.bf16.msra.mxu0 %v3525_v14  ;;  %1507 = vmatpush1.bf16.msra.mxu1 %v3526_v15  ;;  %v3565_v41 = vld [vmem:[#allocation5 + $0x14c] ss:$16 sps:$4 sm:$0xff]   ;;  %v3567_v42 = vld [vmem:[#allocation5 + $0x140] ss:$16 sps:$4 sm:$0xff]   ;;  %v3568_v43 = vld [vmem:[#allocation5 + $0x148] ss:$16 sps:$4 sm:$0xff]  }
  0x5a   :  { %1336 = vmatprep.subr.bf16.mxu0 %v3527_v16  ;;  %1508 = vmatprep.subr.bf16.mxu1 %v3529_v17  ;;  %v3569_v44 = vld [vmem:[#allocation5 + $0x164] ss:$16 sps:$4 sm:$0xff]   ;;  %v3571_v45 = vld [vmem:[#allocation5 + $0x16c] ss:$16 sps:$4 sm:$0xff]   ;;  %v3573_v46 = vld [vmem:[#allocation5 + $0x160] ss:$16 sps:$4 sm:$0xff]  }
  0x5b   :  { %v3574_v47 = vld [vmem:[#allocation5 + $0x168] ss:$16 sps:$4 sm:$0xff]   ;;  %v3575_v49 = vld [vmem:[#allocation5 + $0x184] ss:$16 sps:$4 sm:$0xff]   ;;  %v3577_v50 = vld [vmem:[#allocation5 + $0x18c] ss:$16 sps:$4 sm:$0xff]  }
  0x5c   :  { %v3601_v48 = vld [vmem:[#allocation2 + $0x4] ss:$28 sps:$4 sm:$0xff]   ;;  %v3579_v51 = vld [vmem:[#allocation5 + $0x180] ss:$16 sps:$4 sm:$0xff]   ;;  %v3581_v53 = vld [vmem:[#allocation5 + $0x1a4] ss:$16 sps:$4 sm:$0xff]  }
  0x5d   :  { %1337 = vmatpush1.bf16.msra.mxu0 %v3531_v18  ;;  %1509 = vmatpush1.bf16.msra.mxu1 %v3532_v19  ;;  %v3580_v52 = vld [vmem:[#allocation5 + $0x188] ss:$16 sps:$4 sm:$0xff]   ;;  %v3583_v54 = vld [vmem:[#allocation5 + $0x1ac] ss:$16 sps:$4 sm:$0xff]   ;;  %v3585_v55 = vld [vmem:[#allocation5 + $0x1a0] ss:$16 sps:$4 sm:$0xff]  }
  0x5e   :  { %1338 = vmatprep.subr.bf16.mxu0 %v3533_v20  ;;  %1510 = vmatprep.subr.bf16.mxu1 %v3535_v21  ;;  %v3586_v56 = vld [vmem:[#allocation5 + $0x1a8] ss:$16 sps:$4 sm:$0xff]   ;;  %v3587_v57 = vld [vmem:[#allocation5 + $0x1c4] ss:$16 sps:$4 sm:$0xff]   ;;  %v3589_v58 = vld [vmem:[#allocation5 + $0x1cc] ss:$16 sps:$4 sm:$0xff]  }
  0x5f   :  { %1360 = vmatprep.mubr.bf16.mxu0 %v3601_v48  ;;  %1532 = vmatprep.mubr.bf16.mxu1 %v3601_v48  ;;  %v3591_v59 = vld [vmem:[#allocation5 + $0x1c0] ss:$16 sps:$4 sm:$0xff]   ;;  %v3592_v60 = vld [vmem:[#allocation5 + $0x1c8] ss:$16 sps:$4 sm:$0xff]   ;;  %v3593_v61 = vld [vmem:[#allocation5 + $0x1e4] ss:$16 sps:$4 sm:$0xff]  }
  0x60   :  { %v3595_v62 = vld [vmem:[#allocation5 + $0x1ec] ss:$16 sps:$4 sm:$0xff]   ;;  %v3597_v63 = vld [vmem:[#allocation5 + $0x1e0] ss:$16 sps:$4 sm:$0xff]   ;;  %v3598_v0 = vld [vmem:[#allocation5 + $0x1e8] ss:$16 sps:$4 sm:$0xff]  }
  0x61   :  { %1339 = vmatpush1.bf16.msra.mxu0 %v3537_v22  ;;  %1511 = vmatpush1.bf16.msra.mxu1 %v3538_v23  ;;  %v3604_v1 = vld [vmem:[#allocation5 + $0x204] ss:$16 sps:$4 sm:$0xff]   ;;  %v3607_v2 = vld [vmem:[#allocation5 + $0x20c] ss:$16 sps:$4 sm:$0xff]   ;;  %v3602_v4 = vld [vmem:[#allocation5 + $0x200] ss:$16 sps:$4 sm:$0xff]  }
  0x62   :  { %1340 = vmatprep.subr.bf16.mxu0 %v3539_v24  ;;  %1512 = vmatprep.subr.bf16.mxu1 %v3541_v25  ;;  %v3599_v3 = vld [vmem:[#allocation2] ss:$28 sps:$4 sm:$0xff]   ;;  %v3613_v7 = vld [vmem:[#allocation5 + $0x22c] ss:$16 sps:$4 sm:$0xff]   ;;  %v3608_v8 = vld [vmem:[#allocation5 + $0x220] ss:$16 sps:$4 sm:$0xff]  }
  0x63   :  { %v3605_v5 = vld [vmem:[#allocation5 + $0x208] ss:$16 sps:$4 sm:$0xff]   ;;  %v3610_v6 = vld [vmem:[#allocation5 + $0x224] ss:$16 sps:$4 sm:$0xff]   ;;  %v3619_v11 = vld [vmem:[#allocation5 + $0x24c] ss:$16 sps:$4 sm:$0xff]  }
  0x64   :  { %v3611_v9 = vld [vmem:[#allocation5 + $0x228] ss:$16 sps:$4 sm:$0xff]   ;;  %v3616_v10 = vld [vmem:[#allocation5 + $0x244] ss:$16 sps:$4 sm:$0xff]   ;;  %v3614_v12 = vld [vmem:[#allocation5 + $0x240] ss:$16 sps:$4 sm:$0xff]  }
  0x65   :  { %1341 = vmatpush1.bf16.msra.mxu0 %v3543_v26  ;;  %1513 = vmatpush1.bf16.msra.mxu1 %v3544_v27  ;;  %v3617_v13 = vld [vmem:[#allocation5 + $0x248] ss:$16 sps:$4 sm:$0xff]   ;;  %v3622_v14 = vld [vmem:[#allocation5 + $0x264] ss:$16 sps:$4 sm:$0xff]   ;;  %v3625_v15 = vld [vmem:[#allocation5 + $0x26c] ss:$16 sps:$4 sm:$0xff]  }
  0x66   :  { %1342 = vmatprep.subr.bf16.mxu0 %v3545_v28  ;;  %1514 = vmatprep.subr.bf16.mxu1 %v3547_v29  ;;  %v3620_v16 = vld [vmem:[#allocation5 + $0x260] ss:$16 sps:$4 sm:$0xff]   ;;  %v3623_v17 = vld [vmem:[#allocation5 + $0x268] ss:$16 sps:$4 sm:$0xff]   ;;  %v3628_v18 = vld [vmem:[#allocation5 + $0x284] ss:$16 sps:$4 sm:$0xff]  }
  0x67   :  { %v3631_v19 = vld [vmem:[#allocation5 + $0x28c] ss:$16 sps:$4 sm:$0xff]   ;;  %v3626_v20 = vld [vmem:[#allocation5 + $0x280] ss:$16 sps:$4 sm:$0xff]   ;;  %v3629_v21 = vld [vmem:[#allocation5 + $0x288] ss:$16 sps:$4 sm:$0xff]  }
  0x68   :  { %v3634_v22 = vld [vmem:[#allocation5 + $0x2a4] ss:$16 sps:$4 sm:$0xff]   ;;  %v3637_v23 = vld [vmem:[#allocation5 + $0x2ac] ss:$16 sps:$4 sm:$0xff]   ;;  %v3632_v24 = vld [vmem:[#allocation5 + $0x2a0] ss:$16 sps:$4 sm:$0xff]  }
  0x69   :  { %1343 = vmatpush1.bf16.msra.mxu0 %v3549_v30  ;;  %1515 = vmatpush1.bf16.msra.mxu1 %v3550_v31  ;;  %v3635_v25 = vld [vmem:[#allocation5 + $0x2a8] ss:$16 sps:$4 sm:$0xff]   ;;  %v3640_v26 = vld [vmem:[#allocation5 + $0x2c4] ss:$16 sps:$4 sm:$0xff]   ;;  %v3643_v27 = vld [vmem:[#allocation5 + $0x2cc] ss:$16 sps:$4 sm:$0xff]  }
  0x6a   :  { %1344 = vmatprep.subr.bf16.mxu0 %v3551_v32  ;;  %1516 = vmatprep.subr.bf16.mxu1 %v3553_v33  ;;  %v3638_v28 = vld [vmem:[#allocation5 + $0x2c0] ss:$16 sps:$4 sm:$0xff]   ;;  %v3641_v29 = vld [vmem:[#allocation5 + $0x2c8] ss:$16 sps:$4 sm:$0xff]   ;;  %v3646_v31 = vld [vmem:[#allocation5 + $0x2e4] ss:$16 sps:$4 sm:$0xff]  }
  0x6b   :  { %v3700_v30 = vld [vmem:[#allocation2 + $0xc] ss:$28 sps:$4 sm:$0xff]   ;;  %v3649_v32 = vld [vmem:[#allocation5 + $0x2ec] ss:$16 sps:$4 sm:$0xff]   ;;  %vm1324_vm0 = vcmask 130048   ;;  %s4160_s8 = smov [#allocation10]  }
  0x6c   :  { %v3644_v33 = vld [vmem:[#allocation5 + $0x2e0] ss:$16 sps:$4 sm:$0xff]   ;;  %v3673_v48 = vld [vmem:[#allocation5 + $0x36c] ss:$16 sps:$4 sm:$0xff]   ;;  %s3010_s9 = sshll.u32 %s4160_s8, 4  ;;  %s3011_s9 = int_to_ptr.vmem [resolvable:$true] %s3010_s9 }
  0x6d   :  { %1345 = vmatpush1.bf16.msra.mxu0 %v3555_v34  ;;  %1517 = vmatpush1.bf16.msra.mxu1 %v3556_v35  ;;  %v3647_v34 = vld [vmem:[#allocation5 + $0x2e8] ss:$16 sps:$4 sm:$0xff]   ;;  %v3652_v35 = vld [vmem:[#allocation5 + $0x304] ss:$16 sps:$4 sm:$0xff]   ;;  %p4124_p5 = scmp.lt.s32.totalorder %s3011_s9, %s3011_s9 }
  0x6e   :  { %1346 = vmatprep.subr.bf16.mxu0 %v3557_v36  ;;  %1518 = vmatprep.subr.bf16.mxu1 %v3559_v37  ;;  %v3655_v36 = vld [vmem:[#allocation5 + $0x30c] ss:$16 sps:$4 sm:$0xff]   ;;  %v3650_v37 = vld [vmem:[#allocation5 + $0x300] ss:$16 sps:$4 sm:$0xff]  }
  0x71   :  { %1347 = vmatpush1.bf16.msra.mxu0 %v3561_v38  ;;  %1519 = vmatpush1.bf16.msra.mxu1 %v3562_v39  ;;  %v3653_v38 = vld [vmem:[#allocation5 + $0x308] ss:$16 sps:$4 sm:$0xff]   ;;  %v3658_v39 = vld [vmem:[#allocation5 + $0x324] ss:$16 sps:$4 sm:$0xff]  }
  0x72   :  { %1348 = vmatprep.subr.bf16.mxu0 %v3563_v40  ;;  %1520 = vmatprep.subr.bf16.mxu1 %v3565_v41  ;;  %v3661_v40 = vld [vmem:[#allocation5 + $0x32c] ss:$16 sps:$4 sm:$0xff]   ;;  %v3656_v41 = vld [vmem:[#allocation5 + $0x320] ss:$16 sps:$4 sm:$0xff]  }
  0x75   :  { %1349 = vmatpush1.bf16.msra.mxu0 %v3567_v42  ;;  %1521 = vmatpush1.bf16.msra.mxu1 %v3568_v43  ;;  %v3659_v42 = vld [vmem:[#allocation5 + $0x328] ss:$16 sps:$4 sm:$0xff]   ;;  %v3664_v43 = vld [vmem:[#allocation5 + $0x344] ss:$16 sps:$4 sm:$0xff]  }
  0x76   :  { %1350 = vmatprep.subr.bf16.mxu0 %v3569_v44  ;;  %1522 = vmatprep.subr.bf16.mxu1 %v3571_v45  ;;  %v3667_v44 = vld [vmem:[#allocation5 + $0x34c] ss:$16 sps:$4 sm:$0xff]   ;;  %v3662_v45 = vld [vmem:[#allocation5 + $0x340] ss:$16 sps:$4 sm:$0xff]  }
  0x79   :  { %1351 = vmatpush1.bf16.msra.mxu0 %v3573_v46  ;;  %1523 = vmatpush1.bf16.msra.mxu1 %v3574_v47  ;;  %v3665_v46 = vld [vmem:[#allocation5 + $0x348] ss:$16 sps:$4 sm:$0xff]   ;;  %v3670_v47 = vld [vmem:[#allocation5 + $0x364] ss:$16 sps:$4 sm:$0xff]  }
  0x7a   :  { %1352 = vmatprep.subr.bf16.mxu0 %v3575_v49  ;;  %1524 = vmatprep.subr.bf16.mxu1 %v3577_v50  ;;  %v3668_v49 = vld [vmem:[#allocation5 + $0x360] ss:$16 sps:$4 sm:$0xff]   ;;  %v3671_v50 = vld [vmem:[#allocation5 + $0x368] ss:$16 sps:$4 sm:$0xff]  }
  0x7d   :  { %1353 = vmatpush1.bf16.msra.mxu0 %v3579_v51  ;;  %1525 = vmatpush1.bf16.msra.mxu1 %v3580_v52  ;;  %v3676_v51 = vld [vmem:[#allocation5 + $0x384] ss:$16 sps:$4 sm:$0xff]   ;;  %v3679_v52 = vld [vmem:[#allocation5 + $0x38c] ss:$16 sps:$4 sm:$0xff]  }
  0x7e   :  { %1354 = vmatprep.subr.bf16.mxu0 %v3581_v53  ;;  %1526 = vmatprep.subr.bf16.mxu1 %v3583_v54  ;;  %v3674_v53 = vld [vmem:[#allocation5 + $0x380] ss:$16 sps:$4 sm:$0xff]   ;;  %v3677_v54 = vld [vmem:[#allocation5 + $0x388] ss:$16 sps:$4 sm:$0xff]  }
  0x81   :  { %1355 = vmatpush1.bf16.msra.mxu0 %v3585_v55  ;;  %1527 = vmatpush1.bf16.msra.mxu1 %v3586_v56  ;;  %v3682_v55 = vld [vmem:[#allocation5 + $0x3a4] ss:$16 sps:$4 sm:$0xff]   ;;  %v3685_v56 = vld [vmem:[#allocation5 + $0x3ac] ss:$16 sps:$4 sm:$0xff]  }
  0x82   :  { %1356 = vmatprep.subr.bf16.mxu0 %v3587_v57  ;;  %1528 = vmatprep.subr.bf16.mxu1 %v3589_v58  ;;  %v3680_v57 = vld [vmem:[#allocation5 + $0x3a0] ss:$16 sps:$4 sm:$0xff]   ;;  %v3683_v58 = vld [vmem:[#allocation5 + $0x3a8] ss:$16 sps:$4 sm:$0xff]  }
  0x85   :  { %1357 = vmatpush1.bf16.msra.mxu0 %v3591_v59  ;;  %1529 = vmatpush1.bf16.msra.mxu1 %v3592_v60  ;;  %v3688_v59 = vld [vmem:[#allocation5 + $0x3c4] ss:$16 sps:$4 sm:$0xff]   ;;  %v3691_v60 = vld [vmem:[#allocation5 + $0x3cc] ss:$16 sps:$4 sm:$0xff]  }
  0x86   :  { %1358 = vmatprep.subr.bf16.mxu0 %v3593_v61  ;;  %1530 = vmatprep.subr.bf16.mxu1 %v3595_v62  ;;  %v3686_v61 = vld [vmem:[#allocation5 + $0x3c0] ss:$16 sps:$4 sm:$0xff]   ;;  %v3689_v62 = vld [vmem:[#allocation5 + $0x3c8] ss:$16 sps:$4 sm:$0xff]  }
  0x89   :  { %1359 = vmatpush1.bf16.msra.mxu0 %v3597_v63  ;;  %1531 = vmatpush1.bf16.msra.mxu1 %v3598_v0  ;;  %v3694_v63 = vld [vmem:[#allocation5 + $0x3e4] ss:$16 sps:$4 sm:$0xff]   ;;  %v3697_v0 = vld [vmem:[#allocation5 + $0x3ec] ss:$16 sps:$4 sm:$0xff]  }
  0x8a   :  { %1371 = vmatprep.subr.bf16.mxu0 %v3604_v1  ;;  %1543 = vmatprep.subr.bf16.mxu1 %v3607_v2  ;;  %v3692_v1 = vld [vmem:[#allocation5 + $0x3e0] ss:$16 sps:$4 sm:$0xff]   ;;  %v3695_v2 = vld [vmem:[#allocation5 + $0x3e8] ss:$16 sps:$4 sm:$0xff]  }
  0x8c   :  { %1361 = vmatmul.mubr.bf16.vlgmr.msra.gmra.mrb[0].mxu0 %v3599_v3  ;;  %1533 = vmatmul.mubr.bf16.vlgmr.msra.gmra.mrb[0].mxu1 %v3599_v3  ;;  %v3703_v3 = vld [vmem:[#allocation5 + $0x404] ss:$16 sps:$4 sm:$0xff]  }
  0x8d   :  { %1372 = vmatpush1.bf16.msra.mxu0 %v3602_v4  ;;  %1544 = vmatpush1.bf16.msra.mxu1 %v3605_v5  ;;  %v3706_v4 = vld [vmem:[#allocation5 + $0x40c] ss:$16 sps:$4 sm:$0xff]  }
  0x8e   :  { %1373 = vmatprep.subr.bf16.mxu0 %v3610_v6  ;;  %1545 = vmatprep.subr.bf16.mxu1 %v3613_v7  ;;  %v3698_v5 = vld [vmem:[#allocation2 + $0x8] ss:$28 sps:$4 sm:$0xff]   ;;  %v3704_v7 = vld [vmem:[#allocation5 + $0x408] ss:$16 sps:$4 sm:$0xff]  }
  0x8f   :  { %1403 = vmatprep.mubr.bf16.mxu0 %v3700_v30  ;;  %1575 = vmatprep.mubr.bf16.mxu1 %v3700_v30  ;;  %v3701_v6 = vld [vmem:[#allocation5 + $0x400] ss:$16 sps:$4 sm:$0xff]   ;;  %v3742_v30 = vld [vmem:[#allocation5 + $0x4cc] ss:$16 sps:$4 sm:$0xff]  }
  0x91   :  { %1374 = vmatpush1.bf16.msra.mxu0 %v3608_v8  ;;  %1546 = vmatpush1.bf16.msra.mxu1 %v3611_v9  ;;  %v3709_v8 = vld [vmem:[#allocation5 + $0x424] ss:$16 sps:$4 sm:$0xff]   ;;  %v3712_v9 = vld [vmem:[#allocation5 + $0x42c] ss:$16 sps:$4 sm:$0xff]  }
  0x92   :  { %1375 = vmatprep.subr.bf16.mxu0 %v3616_v10  ;;  %1547 = vmatprep.subr.bf16.mxu1 %v3619_v11  ;;  %v3707_v10 = vld [vmem:[#allocation5 + $0x420] ss:$16 sps:$4 sm:$0xff]   ;;  %v3710_v11 = vld [vmem:[#allocation5 + $0x428] ss:$16 sps:$4 sm:$0xff]  }
  0x95   :  { %1376 = vmatpush1.bf16.msra.mxu0 %v3614_v12  ;;  %1548 = vmatpush1.bf16.msra.mxu1 %v3617_v13  ;;  %v3799_v12 = vld [vmem:[#allocation2 + $0x14] ss:$28 sps:$4 sm:$0xff]   ;;  %v3715_v13 = vld [vmem:[#allocation5 + $0x444] ss:$16 sps:$4 sm:$0xff]  }
  0x96   :  { %1377 = vmatprep.subr.bf16.mxu0 %v3622_v14  ;;  %1549 = vmatprep.subr.bf16.mxu1 %v3625_v15  ;;  %v3718_v14 = vld [vmem:[#allocation5 + $0x44c] ss:$16 sps:$4 sm:$0xff]   ;;  %v3713_v15 = vld [vmem:[#allocation5 + $0x440] ss:$16 sps:$4 sm:$0xff]  }
  0x99   :  { %1378 = vmatpush1.bf16.msra.mxu0 %v3620_v16  ;;  %1550 = vmatpush1.bf16.msra.mxu1 %v3623_v17  ;;  %v3716_v16 = vld [vmem:[#allocation5 + $0x448] ss:$16 sps:$4 sm:$0xff]   ;;  %v3721_v17 = vld [vmem:[#allocation5 + $0x464] ss:$16 sps:$4 sm:$0xff]  }
  0x9a   :  { %1379 = vmatprep.subr.bf16.mxu0 %v3628_v18  ;;  %1551 = vmatprep.subr.bf16.mxu1 %v3631_v19  ;;  %v3724_v18 = vld [vmem:[#allocation5 + $0x46c] ss:$16 sps:$4 sm:$0xff]   ;;  %v3719_v19 = vld [vmem:[#allocation5 + $0x460] ss:$16 sps:$4 sm:$0xff]  }
  0x9d   :  { %1380 = vmatpush1.bf16.msra.mxu0 %v3626_v20  ;;  %1552 = vmatpush1.bf16.msra.mxu1 %v3629_v21  ;;  %v3722_v20 = vld [vmem:[#allocation5 + $0x468] ss:$16 sps:$4 sm:$0xff]   ;;  %v3727_v21 = vld [vmem:[#allocation5 + $0x484] ss:$16 sps:$4 sm:$0xff]  }
  0x9e   :  { %1381 = vmatprep.subr.bf16.mxu0 %v3634_v22  ;;  %1553 = vmatprep.subr.bf16.mxu1 %v3637_v23  ;;  %v3730_v22 = vld [vmem:[#allocation5 + $0x48c] ss:$16 sps:$4 sm:$0xff]   ;;  %v3725_v23 = vld [vmem:[#allocation5 + $0x480] ss:$16 sps:$4 sm:$0xff]  }
  0xa1   :  { %1382 = vmatpush1.bf16.msra.mxu0 %v3632_v24  ;;  %1554 = vmatpush1.bf16.msra.mxu1 %v3635_v25  ;;  %v3728_v24 = vld [vmem:[#allocation5 + $0x488] ss:$16 sps:$4 sm:$0xff]   ;;  %v3733_v25 = vld [vmem:[#allocation5 + $0x4a4] ss:$16 sps:$4 sm:$0xff]  }
  0xa2   :  { %1383 = vmatprep.subr.bf16.mxu0 %v3640_v26  ;;  %1555 = vmatprep.subr.bf16.mxu1 %v3643_v27  ;;  %v3736_v26 = vld [vmem:[#allocation5 + $0x4ac] ss:$16 sps:$4 sm:$0xff]   ;;  %v3731_v27 = vld [vmem:[#allocation5 + $0x4a0] ss:$16 sps:$4 sm:$0xff]  }
  0xa5   :  { %1384 = vmatpush1.bf16.msra.mxu0 %v3638_v28  ;;  %1556 = vmatpush1.bf16.msra.mxu1 %v3641_v29  ;;  %v3734_v28 = vld [vmem:[#allocation5 + $0x4a8] ss:$16 sps:$4 sm:$0xff]   ;;  %v3739_v29 = vld [vmem:[#allocation5 + $0x4c4] ss:$16 sps:$4 sm:$0xff]  }
  0xa6   :  { %1385 = vmatprep.subr.bf16.mxu0 %v3646_v31  ;;  %1557 = vmatprep.subr.bf16.mxu1 %v3649_v32  ;;  %v3737_v31 = vld [vmem:[#allocation5 + $0x4c0] ss:$16 sps:$4 sm:$0xff]   ;;  %v3740_v32 = vld [vmem:[#allocation5 + $0x4c8] ss:$16 sps:$4 sm:$0xff]  }
  0xa9   :  { %1386 = vmatpush1.bf16.msra.mxu0 %v3644_v33  ;;  %1558 = vmatpush1.bf16.msra.mxu1 %v3647_v34  ;;  %v3745_v33 = vld [vmem:[#allocation5 + $0x4e4] ss:$16 sps:$4 sm:$0xff]   ;;  %v3748_v34 = vld [vmem:[#allocation5 + $0x4ec] ss:$16 sps:$4 sm:$0xff]  }
  0xaa   :  { %1387 = vmatprep.subr.bf16.mxu0 %v3652_v35  ;;  %1559 = vmatprep.subr.bf16.mxu1 %v3655_v36  ;;  %v3743_v35 = vld [vmem:[#allocation5 + $0x4e0] ss:$16 sps:$4 sm:$0xff]   ;;  %v3746_v36 = vld [vmem:[#allocation5 + $0x4e8] ss:$16 sps:$4 sm:$0xff]  }
  0xad   :  { %1388 = vmatpush1.bf16.msra.mxu0 %v3650_v37  ;;  %1560 = vmatpush1.bf16.msra.mxu1 %v3653_v38  ;;  %v3751_v37 = vld [vmem:[#allocation5 + $0x504] ss:$16 sps:$4 sm:$0xff]   ;;  %v3754_v38 = vld [vmem:[#allocation5 + $0x50c] ss:$16 sps:$4 sm:$0xff]  }
  0xae   :  { %1389 = vmatprep.subr.bf16.mxu0 %v3658_v39  ;;  %1561 = vmatprep.subr.bf16.mxu1 %v3661_v40  ;;  %v3749_v39 = vld [vmem:[#allocation5 + $0x500] ss:$16 sps:$4 sm:$0xff]   ;;  %v3752_v40 = vld [vmem:[#allocation5 + $0x508] ss:$16 sps:$4 sm:$0xff]  }
  0xb1   :  { %1390 = vmatpush1.bf16.msra.mxu0 %v3656_v41  ;;  %1562 = vmatpush1.bf16.msra.mxu1 %v3659_v42  ;;  %v3757_v41 = vld [vmem:[#allocation5 + $0x524] ss:$16 sps:$4 sm:$0xff]   ;;  %v3760_v42 = vld [vmem:[#allocation5 + $0x52c] ss:$16 sps:$4 sm:$0xff]  }
  0xb2   :  { %1391 = vmatprep.subr.bf16.mxu0 %v3664_v43  ;;  %1563 = vmatprep.subr.bf16.mxu1 %v3667_v44  ;;  %v3755_v43 = vld [vmem:[#allocation5 + $0x520] ss:$16 sps:$4 sm:$0xff]   ;;  %v3758_v44 = vld [vmem:[#allocation5 + $0x528] ss:$16 sps:$4 sm:$0xff]  }
  0xb5   :  { %1392 = vmatpush1.bf16.msra.mxu0 %v3662_v45  ;;  %1564 = vmatpush1.bf16.msra.mxu1 %v3665_v46  ;;  %v3763_v45 = vld [vmem:[#allocation5 + $0x544] ss:$16 sps:$4 sm:$0xff]   ;;  %v3766_v46 = vld [vmem:[#allocation5 + $0x54c] ss:$16 sps:$4 sm:$0xff]  }
  0xb6   :  { %1393 = vmatprep.subr.bf16.mxu0 %v3670_v47  ;;  %1565 = vmatprep.subr.bf16.mxu1 %v3673_v48  ;;  %v3761_v47 = vld [vmem:[#allocation5 + $0x540] ss:$16 sps:$4 sm:$0xff]   ;;  %v3764_v48 = vld [vmem:[#allocation5 + $0x548] ss:$16 sps:$4 sm:$0xff]  }
  0xb9   :  { %1394 = vmatpush1.bf16.msra.mxu0 %v3668_v49  ;;  %1566 = vmatpush1.bf16.msra.mxu1 %v3671_v50  ;;  %v3769_v49 = vld [vmem:[#allocation5 + $0x564] ss:$16 sps:$4 sm:$0xff]   ;;  %v3772_v50 = vld [vmem:[#allocation5 + $0x56c] ss:$16 sps:$4 sm:$0xff]  }
  0xba   :  { %1395 = vmatprep.subr.bf16.mxu0 %v3676_v51  ;;  %1567 = vmatprep.subr.bf16.mxu1 %v3679_v52  ;;  %v3767_v51 = vld [vmem:[#allocation5 + $0x560] ss:$16 sps:$4 sm:$0xff]   ;;  %v3770_v52 = vld [vmem:[#allocation5 + $0x568] ss:$16 sps:$4 sm:$0xff]  }
  0xbd   :  { %1396 = vmatpush1.bf16.msra.mxu0 %v3674_v53  ;;  %1568 = vmatpush1.bf16.msra.mxu1 %v3677_v54  ;;  %v3775_v53 = vld [vmem:[#allocation5 + $0x584] ss:$16 sps:$4 sm:$0xff]   ;;  %v3778_v54 = vld [vmem:[#allocation5 + $0x58c] ss:$16 sps:$4 sm:$0xff]  }
  0xbe   :  { %1397 = vmatprep.subr.bf16.mxu0 %v3682_v55  ;;  %1569 = vmatprep.subr.bf16.mxu1 %v3685_v56  ;;  %v3773_v55 = vld [vmem:[#allocation5 + $0x580] ss:$16 sps:$4 sm:$0xff]   ;;  %v3776_v56 = vld [vmem:[#allocation5 + $0x588] ss:$16 sps:$4 sm:$0xff]  }
  0xc1   :  { %1398 = vmatpush1.bf16.msra.mxu0 %v3680_v57  ;;  %1570 = vmatpush1.bf16.msra.mxu1 %v3683_v58  ;;  %v3781_v57 = vld [vmem:[#allocation5 + $0x5a4] ss:$16 sps:$4 sm:$0xff]   ;;  %v3784_v58 = vld [vmem:[#allocation5 + $0x5ac] ss:$16 sps:$4 sm:$0xff]  }
  0xc2   :  { %1399 = vmatprep.subr.bf16.mxu0 %v3688_v59  ;;  %1571 = vmatprep.subr.bf16.mxu1 %v3691_v60  ;;  %v3779_v59 = vld [vmem:[#allocation5 + $0x5a0] ss:$16 sps:$4 sm:$0xff]   ;;  %v3782_v60 = vld [vmem:[#allocation5 + $0x5a8] ss:$16 sps:$4 sm:$0xff]  }
  0xc5   :  { %1400 = vmatpush1.bf16.msra.mxu0 %v3686_v61  ;;  %1572 = vmatpush1.bf16.msra.mxu1 %v3689_v62  ;;  %v3787_v61 = vld [vmem:[#allocation5 + $0x5c4] ss:$16 sps:$4 sm:$0xff]   ;;  %v3790_v62 = vld [vmem:[#allocation5 + $0x5cc] ss:$16 sps:$4 sm:$0xff]  }
  0xc6   :  { %1401 = vmatprep.subr.bf16.mxu0 %v3694_v63  ;;  %1573 = vmatprep.subr.bf16.mxu1 %v3697_v0  ;;  %v3785_v63 = vld [vmem:[#allocation5 + $0x5c0] ss:$16 sps:$4 sm:$0xff]   ;;  %v3788_v0 = vld [vmem:[#allocation5 + $0x5c8] ss:$16 sps:$4 sm:$0xff]  }
  0xc9   :  { %1402 = vmatpush1.bf16.msra.mxu0 %v3692_v1  ;;  %1574 = vmatpush1.bf16.msra.mxu1 %v3695_v2  ;;  %v3793_v1 = vld [vmem:[#allocation5 + $0x5e4] ss:$16 sps:$4 sm:$0xff]   ;;  %v3796_v2 = vld [vmem:[#allocation5 + $0x5ec] ss:$16 sps:$4 sm:$0xff]  }
  0xca   :  { %1414 = vmatprep.subr.bf16.mxu0 %v3703_v3  ;;  %1586 = vmatprep.subr.bf16.mxu1 %v3706_v4  ;;  %v3791_v3 = vld [vmem:[#allocation5 + $0x5e0] ss:$16 sps:$4 sm:$0xff]   ;;  %v3794_v4 = vld [vmem:[#allocation5 + $0x5e8] ss:$16 sps:$4 sm:$0xff]  }
  0xcc   :  { %1404 = vmatmul.mubr.bf16.vlgmr.msra.gmra.mrb[0].mxu0 %v3698_v5  ;;  %1576 = vmatmul.mubr.bf16.vlgmr.msra.gmra.mrb[0].mxu1 %v3698_v5  ;;  %v3802_v5 = vld [vmem:[#allocation5 + $0x604] ss:$16 sps:$4 sm:$0xff]  }
  0xcd   :  { %1415 = vmatpush1.bf16.msra.mxu0 %v3701_v6  ;;  %1587 = vmatpush1.bf16.msra.mxu1 %v3704_v7  ;;  %v3805_v6 = vld [vmem:[#allocation5 + $0x60c] ss:$16 sps:$4 sm:$0xff]   ;;  %v3797_v7 = vld [vmem:[#allocation2 + $0x10] ss:$28 sps:$4 sm:$0xff]  }
  0xce   :  { %1416 = vmatprep.subr.bf16.mxu0 %v3709_v8  ;;  %1588 = vmatprep.subr.bf16.mxu1 %v3712_v9  ;;  %v3800_v8 = vld [vmem:[#allocation5 + $0x600] ss:$16 sps:$4 sm:$0xff]   ;;  %v3803_v9 = vld [vmem:[#allocation5 + $0x608] ss:$16 sps:$4 sm:$0xff]  }
  0xcf   :  { %1446 = vmatprep.mubr.bf16.mxu0 %v3799_v12  ;;  %1618 = vmatprep.mubr.bf16.mxu1 %v3799_v12  ;;  %v4159_v12 = vmov 0  }
  0xd1   :  { %1417 = vmatpush1.bf16.msra.mxu0 %v3707_v10  ;;  %1589 = vmatpush1.bf16.msra.mxu1 %v3710_v11  ;;  %v3809_v10 = vld [vmem:[#allocation7 + $0x4] ss:$16 sps:$4 sm:$0xff]   ;;  %v3812_v11 = vld [vmem:[#allocation7 + $0xc] ss:$16 sps:$4 sm:$0xff]  }
  0xd2   :  { %1418 = vmatprep.subr.bf16.mxu0 %v3715_v13  ;;  %1590 = vmatprep.subr.bf16.mxu1 %v3718_v14  ;;  %v3806_v13 = vld [vmem:[#allocation2 + $0x18] ss:$28 sps:$4 sm:$0xff]  }
  0xd3   :  { %v3807_v14 = vld [vmem:[#allocation7] ss:$16 sps:$4 sm:$0xff]  }
  0xd5   :  { %1419 = vmatpush1.bf16.msra.mxu0 %v3713_v15  ;;  %1591 = vmatpush1.bf16.msra.mxu1 %v3716_v16  ;;  %v3810_v15 = vld [vmem:[#allocation7 + $0x8] ss:$16 sps:$4 sm:$0xff]   ;;  %v3815_v16 = vld [vmem:[#allocation7 + $0x24] ss:$16 sps:$4 sm:$0xff]  }
  0xd6   :  { %1420 = vmatprep.subr.bf16.mxu0 %v3721_v17  ;;  %1592 = vmatprep.subr.bf16.mxu1 %v3724_v18  ;;  %v3818_v17 = vld [vmem:[#allocation7 + $0x2c] ss:$16 sps:$4 sm:$0xff]   ;;  %v3813_v18 = vld [vmem:[#allocation7 + $0x20] ss:$16 sps:$4 sm:$0xff]  }
  0xd9   :  { %1421 = vmatpush1.bf16.msra.mxu0 %v3719_v19  ;;  %1593 = vmatpush1.bf16.msra.mxu1 %v3722_v20  ;;  %v3816_v19 = vld [vmem:[#allocation7 + $0x28] ss:$16 sps:$4 sm:$0xff]   ;;  %v3821_v20 = vld [vmem:[#allocation7 + $0x44] ss:$16 sps:$4 sm:$0xff]  }
  0xda   :  { %1422 = vmatprep.subr.bf16.mxu0 %v3727_v21  ;;  %1594 = vmatprep.subr.bf16.mxu1 %v3730_v22  ;;  %v3824_v21 = vld [vmem:[#allocation7 + $0x4c] ss:$16 sps:$4 sm:$0xff]   ;;  %v3819_v22 = vld [vmem:[#allocation7 + $0x40] ss:$16 sps:$4 sm:$0xff]  }
  0xdd   :  { %1423 = vmatpush1.bf16.msra.mxu0 %v3725_v23  ;;  %1595 = vmatpush1.bf16.msra.mxu1 %v3728_v24  ;;  %v3822_v23 = vld [vmem:[#allocation7 + $0x48] ss:$16 sps:$4 sm:$0xff]   ;;  %v3827_v24 = vld [vmem:[#allocation7 + $0x64] ss:$16 sps:$4 sm:$0xff]  }
  0xde   :  { %1424 = vmatprep.subr.bf16.mxu0 %v3733_v25  ;;  %1596 = vmatprep.subr.bf16.mxu1 %v3736_v26  ;;  %v3830_v25 = vld [vmem:[#allocation7 + $0x6c] ss:$16 sps:$4 sm:$0xff]   ;;  %v3825_v26 = vld [vmem:[#allocation7 + $0x60] ss:$16 sps:$4 sm:$0xff]  }
  0xe1   :  { %1425 = vmatpush1.bf16.msra.mxu0 %v3731_v27  ;;  %1597 = vmatpush1.bf16.msra.mxu1 %v3734_v28  ;;  %v3828_v27 = vld [vmem:[#allocation7 + $0x68] ss:$16 sps:$4 sm:$0xff]   ;;  %v3833_v28 = vld [vmem:[#allocation7 + $0x84] ss:$16 sps:$4 sm:$0xff]  }
  0xe2   :  { %1426 = vmatprep.subr.bf16.mxu0 %v3739_v29  ;;  %1598 = vmatprep.subr.bf16.mxu1 %v3742_v30  ;;  %v3836_v29 = vld [vmem:[#allocation7 + $0x8c] ss:$16 sps:$4 sm:$0xff]   ;;  %v3831_v30 = vld [vmem:[#allocation7 + $0x80] ss:$16 sps:$4 sm:$0xff]  }
  0xe5   :  { %1427 = vmatpush1.bf16.msra.mxu0 %v3737_v31  ;;  %1599 = vmatpush1.bf16.msra.mxu1 %v3740_v32  ;;  %v3834_v31 = vld [vmem:[#allocation7 + $0x88] ss:$16 sps:$4 sm:$0xff]   ;;  %v3839_v32 = vld [vmem:[#allocation7 + $0xa4] ss:$16 sps:$4 sm:$0xff]  }
  0xe6   :  { %1428 = vmatprep.subr.bf16.mxu0 %v3745_v33  ;;  %1600 = vmatprep.subr.bf16.mxu1 %v3748_v34  ;;  %v3842_v33 = vld [vmem:[#allocation7 + $0xac] ss:$16 sps:$4 sm:$0xff]   ;;  %v3837_v34 = vld [vmem:[#allocation7 + $0xa0] ss:$16 sps:$4 sm:$0xff]  }
  0xe9   :  { %1429 = vmatpush1.bf16.msra.mxu0 %v3743_v35  ;;  %1601 = vmatpush1.bf16.msra.mxu1 %v3746_v36  ;;  %v3840_v35 = vld [vmem:[#allocation7 + $0xa8] ss:$16 sps:$4 sm:$0xff]   ;;  %v3845_v36 = vld [vmem:[#allocation7 + $0xc4] ss:$16 sps:$4 sm:$0xff]  }
  0xea   :  { %1430 = vmatprep.subr.bf16.mxu0 %v3751_v37  ;;  %1602 = vmatprep.subr.bf16.mxu1 %v3754_v38  ;;  %v3848_v37 = vld [vmem:[#allocation7 + $0xcc] ss:$16 sps:$4 sm:$0xff]   ;;  %v3843_v38 = vld [vmem:[#allocation7 + $0xc0] ss:$16 sps:$4 sm:$0xff]  }
  0xed   :  { %1431 = vmatpush1.bf16.msra.mxu0 %v3749_v39  ;;  %1603 = vmatpush1.bf16.msra.mxu1 %v3752_v40  ;;  %v3846_v39 = vld [vmem:[#allocation7 + $0xc8] ss:$16 sps:$4 sm:$0xff]   ;;  %v3851_v40 = vld [vmem:[#allocation7 + $0xe4] ss:$16 sps:$4 sm:$0xff]  }
  0xee   :  { %1432 = vmatprep.subr.bf16.mxu0 %v3757_v41  ;;  %1604 = vmatprep.subr.bf16.mxu1 %v3760_v42  ;;  %v3854_v41 = vld [vmem:[#allocation7 + $0xec] ss:$16 sps:$4 sm:$0xff]   ;;  %v3849_v42 = vld [vmem:[#allocation7 + $0xe0] ss:$16 sps:$4 sm:$0xff]  }
  0xf1   :  { %1433 = vmatpush1.bf16.msra.mxu0 %v3755_v43  ;;  %1605 = vmatpush1.bf16.msra.mxu1 %v3758_v44  ;;  %v3852_v43 = vld [vmem:[#allocation7 + $0xe8] ss:$16 sps:$4 sm:$0xff]   ;;  %v3857_v44 = vld [vmem:[#allocation7 + $0x104] ss:$16 sps:$4 sm:$0xff]  }
  0xf2   :  { %1434 = vmatprep.subr.bf16.mxu0 %v3763_v45  ;;  %1606 = vmatprep.subr.bf16.mxu1 %v3766_v46  ;;  %v3860_v45 = vld [vmem:[#allocation7 + $0x10c] ss:$16 sps:$4 sm:$0xff]   ;;  %v3855_v46 = vld [vmem:[#allocation7 + $0x100] ss:$16 sps:$4 sm:$0xff]  }
  0xf5   :  { %1435 = vmatpush1.bf16.msra.mxu0 %v3761_v47  ;;  %1607 = vmatpush1.bf16.msra.mxu1 %v3764_v48  ;;  %v3858_v47 = vld [vmem:[#allocation7 + $0x108] ss:$16 sps:$4 sm:$0xff]   ;;  %v3863_v48 = vld [vmem:[#allocation7 + $0x124] ss:$16 sps:$4 sm:$0xff]  }
  0xf6   :  { %1436 = vmatprep.subr.bf16.mxu0 %v3769_v49  ;;  %1608 = vmatprep.subr.bf16.mxu1 %v3772_v50  ;;  %v3866_v49 = vld [vmem:[#allocation7 + $0x12c] ss:$16 sps:$4 sm:$0xff]   ;;  %v3861_v50 = vld [vmem:[#allocation7 + $0x120] ss:$16 sps:$4 sm:$0xff]  }
  0xf9   :  { %1437 = vmatpush1.bf16.msra.mxu0 %v3767_v51  ;;  %1609 = vmatpush1.bf16.msra.mxu1 %v3770_v52  ;;  %v3864_v51 = vld [vmem:[#allocation7 + $0x128] ss:$16 sps:$4 sm:$0xff]   ;;  %v3869_v52 = vld [vmem:[#allocation7 + $0x144] ss:$16 sps:$4 sm:$0xff]  }
  0xfa   :  { %1438 = vmatprep.subr.bf16.mxu0 %v3775_v53  ;;  %1610 = vmatprep.subr.bf16.mxu1 %v3778_v54  ;;  %v3872_v53 = vld [vmem:[#allocation7 + $0x14c] ss:$16 sps:$4 sm:$0xff]   ;;  %v3867_v54 = vld [vmem:[#allocation7 + $0x140] ss:$16 sps:$4 sm:$0xff]  }
  0xfd   :  { %1439 = vmatpush1.bf16.msra.mxu0 %v3773_v55  ;;  %1611 = vmatpush1.bf16.msra.mxu1 %v3776_v56  ;;  %v3870_v55 = vld [vmem:[#allocation7 + $0x148] ss:$16 sps:$4 sm:$0xff]   ;;  %v3875_v56 = vld [vmem:[#allocation7 + $0x164] ss:$16 sps:$4 sm:$0xff]  }
  0xfe   :  { %1440 = vmatprep.subr.bf16.mxu0 %v3781_v57  ;;  %1612 = vmatprep.subr.bf16.mxu1 %v3784_v58  ;;  %v3878_v57 = vld [vmem:[#allocation7 + $0x16c] ss:$16 sps:$4 sm:$0xff]   ;;  %v3873_v58 = vld [vmem:[#allocation7 + $0x160] ss:$16 sps:$4 sm:$0xff]  }
 0x101   :  { %1441 = vmatpush1.bf16.msra.mxu0 %v3779_v59  ;;  %1613 = vmatpush1.bf16.msra.mxu1 %v3782_v60  ;;  %v3876_v59 = vld [vmem:[#allocation7 + $0x168] ss:$16 sps:$4 sm:$0xff]   ;;  %v3881_v60 = vld [vmem:[#allocation7 + $0x184] ss:$16 sps:$4 sm:$0xff]  }
 0x102   :  { %1442 = vmatprep.subr.bf16.mxu0 %v3787_v61  ;;  %1614 = vmatprep.subr.bf16.mxu1 %v3790_v62  ;;  %v3884_v61 = vld [vmem:[#allocation7 + $0x18c] ss:$16 sps:$4 sm:$0xff]   ;;  %v3879_v62 = vld [vmem:[#allocation7 + $0x180] ss:$16 sps:$4 sm:$0xff]  }
 0x105   :  { %1443 = vmatpush1.bf16.msra.mxu0 %v3785_v63  ;;  %1615 = vmatpush1.bf16.msra.mxu1 %v3788_v0  ;;  %v3882_v63 = vld [vmem:[#allocation7 + $0x188] ss:$16 sps:$4 sm:$0xff]   ;;  %v3887_v0 = vld [vmem:[#allocation7 + $0x1a4] ss:$16 sps:$4 sm:$0xff]  }
 0x106   :  { %1444 = vmatprep.subr.bf16.mxu0 %v3793_v1  ;;  %1616 = vmatprep.subr.bf16.mxu1 %v3796_v2  ;;  %v3890_v1 = vld [vmem:[#allocation7 + $0x1ac] ss:$16 sps:$4 sm:$0xff]   ;;  %v3885_v2 = vld [vmem:[#allocation7 + $0x1a0] ss:$16 sps:$4 sm:$0xff]  }
 0x109   :  { %1445 = vmatpush1.bf16.msra.mxu0 %v3791_v3  ;;  %1617 = vmatpush1.bf16.msra.mxu1 %v3794_v4  ;;  %v3888_v3 = vld [vmem:[#allocation7 + $0x1a8] ss:$16 sps:$4 sm:$0xff]   ;;  %v3893_v4 = vld [vmem:[#allocation7 + $0x1c4] ss:$16 sps:$4 sm:$0xff]  }
 0x10a   :  { %1457 = vmatprep.subr.bf16.mxu0 %v3802_v5  ;;  %1629 = vmatprep.subr.bf16.mxu1 %v3805_v6  ;;  %v3896_v5 = vld [vmem:[#allocation7 + $0x1cc] ss:$16 sps:$4 sm:$0xff]   ;;  %v3891_v6 = vld [vmem:[#allocation7 + $0x1c0] ss:$16 sps:$4 sm:$0xff]  }
 0x10c   :  { %1447 = vmatmul.mubr.bf16.vlgmr.msra.gmra.mrb[0].mxu0 %v3797_v7  ;;  %1619 = vmatmul.mubr.bf16.vlgmr.msra.gmra.mrb[0].mxu1 %v3797_v7  ;;  %v3894_v7 = vld [vmem:[#allocation7 + $0x1c8] ss:$16 sps:$4 sm:$0xff]  }
 0x10d   :  { %1458 = vmatpush1.bf16.msra.mxu0 %v3800_v8  ;;  %1630 = vmatpush1.bf16.msra.mxu1 %v3803_v9  ;;  %v3899_v8 = vld [vmem:[#allocation7 + $0x1e4] ss:$16 sps:$4 sm:$0xff]   ;;  %v3902_v9 = vld [vmem:[#allocation7 + $0x1ec] ss:$16 sps:$4 sm:$0xff]  }
 0x10e   :  { %1489 = vmatprep.mubr.bf16.mxu0 %v4159_v12  ;;  %1661 = vmatprep.mubr.bf16.mxu1 %v4159_v12 }
 0x10f   :  { %2470 = vmatprep.subr.bf16.mxu0 %v3809_v10  ;;  %2556 = vmatprep.subr.bf16.mxu1 %v3812_v11  ;;  %v3897_v10 = vld [vmem:[#allocation7 + $0x1e0] ss:$16 sps:$4 sm:$0xff]   ;;  %v3900_v11 = vld [vmem:[#allocation7 + $0x1e8] ss:$16 sps:$4 sm:$0xff]  }
 0x118   :  { %3227 = vmatmul.mubr.msk.bf16.vlgmr.msra.gmra.mrb[0].mxu0 %vm1324_vm0, %v3806_v13  ;;  %3228 = vmatmul.mubr.msk.bf16.vlgmr.msra.gmra.mrb[0].mxu1 %vm1324_vm0, %v3806_v13  ;;  %v3905_v13 = vld [vmem:[#allocation7 + $0x204] ss:$16 sps:$4 sm:$0xff]  }
 0x119   :  { %2471 = vmatpush1.bf16.msra.mxu0 %v3807_v14  ;;  %2557 = vmatpush1.bf16.msra.mxu1 %v3810_v15  ;;  %v3908_v14 = vld [vmem:[#allocation7 + $0x20c] ss:$16 sps:$4 sm:$0xff]   ;;  %v289_v15 = vlaneseq }
 0x11a   :  { %2472 = vmatprep.subr.bf16.mxu0 %v3815_v16  ;;  %2558 = vmatprep.subr.bf16.mxu1 %v3818_v17 }
 0x11b   :  { %v4267_v16 = vshrl.u32 %v289_v15, 7  ;;  %v3948_v15 = vld [vmem:[#allocation7 + $0x2e8] ss:$16 sps:$4 sm:$0xff]  }
 0x11d   :  { %2473 = vmatpush1.bf16.msra.mxu0 %v3813_v18  ;;  %2559 = vmatpush1.bf16.msra.mxu1 %v3816_v19  ;;  %v291_v17 = vsub.s32 0, %v4267_v16  ;;  %v299_v18 = vsub.s32 2, %v4267_v16  ;;  %v287_v19 = vld [vmem:[%s4332_s2] sm:$0xf] }
 0x11e   :  { %2474 = vmatprep.subr.bf16.mxu0 %v3821_v20  ;;  %2560 = vmatprep.subr.bf16.mxu1 %v3824_v21  ;;  %v295_v20 = vsub.s32 1, %v4267_v16  ;;  %v303_v21 = vsub.s32 3, %v4267_v16 }
 0x121   :  { %2475 = vmatpush1.bf16.msra.mxu0 %v3819_v22  ;;  %2561 = vmatpush1.bf16.msra.mxu1 %v3822_v23  ;;  %v292_v22 = vrot.slane %v287_v19, %v291_v17  ;;  %v300_v23 = vrot.slane %v287_v19, %v299_v18 }
 0x122   :  { %2476 = vmatprep.subr.bf16.mxu0 %v3827_v24  ;;  %2562 = vmatprep.subr.bf16.mxu1 %v3830_v25 }
 0x125   :  { %2477 = vmatpush1.bf16.msra.mxu0 %v3825_v26  ;;  %2563 = vmatpush1.bf16.msra.mxu1 %v3828_v27  ;;  %v296_v26 = vrot.slane %v287_v19, %v295_v20  ;;  %v304_v27 = vrot.slane %v287_v19, %v303_v21  ;;  %v3953_v19 = vld [vmem:[#allocation7 + $0x304] ss:$16 sps:$4 sm:$0xff]  }
 0x126   :  { %2478 = vmatprep.subr.bf16.mxu0 %v3833_v28  ;;  %2564 = vmatprep.subr.bf16.mxu1 %v3836_v29 }
 0x129   :  { %2479 = vmatpush1.bf16.msra.mxu0 %v3831_v30  ;;  %2565 = vmatpush1.bf16.msra.mxu1 %v3834_v31 }
 0x12a   :  { %2480 = vmatprep.subr.bf16.mxu0 %v3839_v32  ;;  %2566 = vmatprep.subr.bf16.mxu1 %v3842_v33 }
 0x12d   :  { %2481 = vmatpush1.bf16.msra.mxu0 %v3837_v34  ;;  %2567 = vmatpush1.bf16.msra.mxu1 %v3840_v35 }
 0x12e   :  { %2482 = vmatprep.subr.bf16.mxu0 %v3845_v36  ;;  %2568 = vmatprep.subr.bf16.mxu1 %v3848_v37 }
 0x131   :  { %2483 = vmatpush1.bf16.msra.mxu0 %v3843_v38  ;;  %2569 = vmatpush1.bf16.msra.mxu1 %v3846_v39 }
 0x132   :  { %2484 = vmatprep.subr.bf16.mxu0 %v3851_v40  ;;  %2570 = vmatprep.subr.bf16.mxu1 %v3854_v41 }
 0x135   :  { %2485 = vmatpush1.bf16.msra.mxu0 %v3849_v42  ;;  %2571 = vmatpush1.bf16.msra.mxu1 %v3852_v43 }
 0x136   :  { %2486 = vmatprep.subr.bf16.mxu0 %v3857_v44  ;;  %2572 = vmatprep.subr.bf16.mxu1 %v3860_v45 }
 0x139   :  { %2487 = vmatpush1.bf16.msra.mxu0 %v3855_v46  ;;  %2573 = vmatpush1.bf16.msra.mxu1 %v3858_v47  ;;  %v3903_v47 = vld [vmem:[#allocation7 + $0x200] ss:$16 sps:$4 sm:$0xff]  }
 0x13a   :  { %2488 = vmatprep.subr.bf16.mxu0 %v3863_v48  ;;  %2574 = vmatprep.subr.bf16.mxu1 %v3866_v49  ;;  %v3906_v48 = vld [vmem:[#allocation7 + $0x208] ss:$16 sps:$4 sm:$0xff]  }
 0x13d   :  { %2489 = vmatpush1.bf16.msra.mxu0 %v3861_v50  ;;  %2575 = vmatpush1.bf16.msra.mxu1 %v3864_v51  ;;  %v3911_v50 = vld [vmem:[#allocation7 + $0x224] ss:$16 sps:$4 sm:$0xff]   ;;  %v3914_v51 = vld [vmem:[#allocation7 + $0x22c] ss:$16 sps:$4 sm:$0xff]  }
 0x13e   :  { %2490 = vmatprep.subr.bf16.mxu0 %v3869_v52  ;;  %2576 = vmatprep.subr.bf16.mxu1 %v3872_v53  ;;  %v3909_v53 = vld [vmem:[#allocation7 + $0x220] ss:$16 sps:$4 sm:$0xff]  }
 0x141   :  { %2491 = vmatpush1.bf16.msra.mxu0 %v3867_v54  ;;  %2577 = vmatpush1.bf16.msra.mxu1 %v3870_v55  ;;  %v3912_v54 = vld [vmem:[#allocation7 + $0x228] ss:$16 sps:$4 sm:$0xff]   ;;  %v3917_v55 = vld [vmem:[#allocation7 + $0x244] ss:$16 sps:$4 sm:$0xff]  }
 0x142   :  { %2492 = vmatprep.subr.bf16.mxu0 %v3875_v56  ;;  %2578 = vmatprep.subr.bf16.mxu1 %v3878_v57  ;;  %v3920_v56 = vld [vmem:[#allocation7 + $0x24c] ss:$16 sps:$4 sm:$0xff]   ;;  %v3915_v57 = vld [vmem:[#allocation7 + $0x240] ss:$16 sps:$4 sm:$0xff]  }
 0x145   :  { %2493 = vmatpush1.bf16.msra.mxu0 %v3873_v58  ;;  %2579 = vmatpush1.bf16.msra.mxu1 %v3876_v59  ;;  %v3918_v58 = vld [vmem:[#allocation7 + $0x248] ss:$16 sps:$4 sm:$0xff]   ;;  %v3923_v59 = vld [vmem:[#allocation7 + $0x264] ss:$16 sps:$4 sm:$0xff]  }
 0x146   :  { %2494 = vmatprep.subr.bf16.mxu0 %v3881_v60  ;;  %2580 = vmatprep.subr.bf16.mxu1 %v3884_v61  ;;  %v3926_v60 = vld [vmem:[#allocation7 + $0x26c] ss:$16 sps:$4 sm:$0xff]   ;;  %v3921_v61 = vld [vmem:[#allocation7 + $0x260] ss:$16 sps:$4 sm:$0xff]  }
 0x149   :  { %2495 = vmatpush1.bf16.msra.mxu0 %v3879_v62  ;;  %2581 = vmatpush1.bf16.msra.mxu1 %v3882_v63  ;;  %v3924_v62 = vld [vmem:[#allocation7 + $0x268] ss:$16 sps:$4 sm:$0xff]   ;;  %v3929_v63 = vld [vmem:[#allocation7 + $0x284] ss:$16 sps:$4 sm:$0xff]  }
 0x14a   :  { %2496 = vmatprep.subr.bf16.mxu0 %v3887_v0  ;;  %2582 = vmatprep.subr.bf16.mxu1 %v3890_v1  ;;  %v3932_v0 = vld [vmem:[#allocation7 + $0x28c] ss:$16 sps:$4 sm:$0xff]   ;;  %v3927_v1 = vld [vmem:[#allocation7 + $0x280] ss:$16 sps:$4 sm:$0xff]  }
 0x14d   :  { %2497 = vmatpush1.bf16.msra.mxu0 %v3885_v2  ;;  %2583 = vmatpush1.bf16.msra.mxu1 %v3888_v3  ;;  %v3930_v2 = vld [vmem:[#allocation7 + $0x288] ss:$16 sps:$4 sm:$0xff]   ;;  %v3935_v3 = vld [vmem:[#allocation7 + $0x2a4] ss:$16 sps:$4 sm:$0xff]  }
 0x14e   :  { %2498 = vmatprep.subr.bf16.mxu0 %v3893_v4  ;;  %2584 = vmatprep.subr.bf16.mxu1 %v3896_v5  ;;  %v3938_v4 = vld [vmem:[#allocation7 + $0x2ac] ss:$16 sps:$4 sm:$0xff]   ;;  %v3933_v5 = vld [vmem:[#allocation7 + $0x2a0] ss:$16 sps:$4 sm:$0xff]  }
 0x151   :  { %2499 = vmatpush1.bf16.msra.mxu0 %v3891_v6  ;;  %2585 = vmatpush1.bf16.msra.mxu1 %v3894_v7  ;;  %v3936_v6 = vld [vmem:[#allocation7 + $0x2a8] ss:$16 sps:$4 sm:$0xff]   ;;  %v3941_v7 = vld [vmem:[#allocation7 + $0x2c4] ss:$16 sps:$4 sm:$0xff]  }
 0x152   :  { %2500 = vmatprep.subr.bf16.mxu0 %v3899_v8  ;;  %2586 = vmatprep.subr.bf16.mxu1 %v3902_v9  ;;  %v3944_v8 = vld [vmem:[#allocation7 + $0x2cc] ss:$16 sps:$4 sm:$0xff]   ;;  %v3939_v9 = vld [vmem:[#allocation7 + $0x2c0] ss:$16 sps:$4 sm:$0xff]  }
 0x155   :  { %2501 = vmatpush1.bf16.msra.mxu0 %v3897_v10  ;;  %2587 = vmatpush1.bf16.msra.mxu1 %v3900_v11  ;;  %v3942_v10 = vld [vmem:[#allocation7 + $0x2c8] ss:$16 sps:$4 sm:$0xff]   ;;  %v3947_v11 = vld [vmem:[#allocation7 + $0x2e4] ss:$16 sps:$4 sm:$0xff]  }
 0x156   :  { %2513 = vmatprep.subr.bf16.mxu0 %v3905_v13  ;;  %2599 = vmatprep.subr.bf16.mxu1 %v3908_v14  ;;  %v3950_v13 = vld [vmem:[#allocation7 + $0x2ec] ss:$16 sps:$4 sm:$0xff]   ;;  %v3945_v14 = vld [vmem:[#allocation7 + $0x2e0] ss:$16 sps:$4 sm:$0xff]  }
 0x1eb   :  { %v1491_v24 = vpop.f32.mrb[0].mxu0  ;;  %v1663_v25 = vpop.f32.mrb[0].mxu1 }
 0x1ec   :  { %v1493_v28 = vpop.f32.mrb[1].mxu0  ;;  %v1665_v29 = vpop.f32.mrb[1].mxu1  ;;  %v3443_v32 = vadd.f32 %v1491_v24, %v292_v22  ;;  %v4284_v33 = vadd.f32 %v1663_v25, %v300_v23  ;;  %v3954_v24 = vld [vmem:[#allocation7 + $0x308] ss:$16 sps:$4 sm:$0xff]   ;;  %v3959_v25 = vld [vmem:[#allocation7 + $0x324] ss:$16 sps:$4 sm:$0xff]  }
 0x1ed   :  { %v1495_v30 = vpop.f32.mrb[2].mxu0  ;;  %v1667_v31 = vpop.f32.mrb[2].mxu1  ;;  %v3444_v38 = vadd.f32 %v1493_v28, %v296_v26  ;;  %v3448_v39 = vadd.f32 %v1665_v29, %v304_v27  ;;  %v3960_v28 = vld [vmem:[#allocation7 + $0x328] ss:$16 sps:$4 sm:$0xff]   ;;  %v3965_v29 = vld [vmem:[#allocation7 + $0x344] ss:$16 sps:$4 sm:$0xff]  }
 0x1ee   :  { %v3445_v34 = vadd.f32 %v1495_v30, %v292_v22  ;;  %v4286_v35 = vadd.f32 %v1667_v31, %v300_v23  ;;  %v1497_v36 = vpop.f32.mrb[3].mxu0  ;;  %v1669_v37 = vpop.f32.mrb[3].mxu1  ;;  %v3956_v22 = vld [vmem:[#allocation7 + $0x30c] ss:$16 sps:$4 sm:$0xff]   ;;  %v3951_v23 = vld [vmem:[#allocation7 + $0x300] ss:$16 sps:$4 sm:$0xff]  }
 0x1ef   :  { %v3446_v40 = vadd.f32 %v1497_v36, %v296_v26  ;;  %v3450_v41 = vadd.f32 %v1669_v37, %v304_v27  ;;  %v3962_v26 = vld [vmem:[#allocation7 + $0x32c] ss:$16 sps:$4 sm:$0xff]   ;;  %v3957_v27 = vld [vmem:[#allocation7 + $0x320] ss:$16 sps:$4 sm:$0xff]  }
 0x1f0   :  { %v1672_v42 = vpack.c.bf16 %v3445_v34, %v3443_v32  ;;  %v1674_v43 = vpack.c.bf16 %v4286_v35, %v4284_v33  ;;  %v3968_v30 = vld [vmem:[#allocation7 + $0x34c] ss:$16 sps:$4 sm:$0xff]   ;;  %v3963_v31 = vld [vmem:[#allocation7 + $0x340] ss:$16 sps:$4 sm:$0xff]   ;;  %v3966_v32 = vld [vmem:[#allocation7 + $0x348] ss:$16 sps:$4 sm:$0xff]  }
 0x1f1   :  { %v1673_v44 = vpack.c.bf16 %v3446_v40, %v3444_v38  ;;  %v1675_v45 = vpack.c.bf16 %v3450_v41, %v3448_v39  ;;  %v3971_v34 = vld [vmem:[#allocation7 + $0x364] ss:$16 sps:$4 sm:$0xff]   ;;  %v3974_v36 = vld [vmem:[#allocation7 + $0x36c] ss:$16 sps:$4 sm:$0xff]   ;;  %v3969_v37 = vld [vmem:[#allocation7 + $0x360] ss:$16 sps:$4 sm:$0xff]  }
 0x1f2   :  { %v1676_v49 = vmax.bf16 %v4159_v12, %v1672_v42  ;;  %v3972_v38 = vld [vmem:[#allocation7 + $0x368] ss:$16 sps:$4 sm:$0xff]   ;;  %v3977_v39 = vld [vmem:[#allocation7 + $0x384] ss:$16 sps:$4 sm:$0xff]   ;;  %v3980_v40 = vld [vmem:[#allocation7 + $0x38c] ss:$16 sps:$4 sm:$0xff]  }
 0x1f3   :  { %v1677_v46 = vmax.bf16 %v4159_v12, %v1673_v44  ;;  %v1679_v52 = vmax.bf16 %v4159_v12, %v1675_v45  ;;  %v3975_v41 = vld [vmem:[#allocation7 + $0x380] ss:$16 sps:$4 sm:$0xff]   ;;  %v3978_v42 = vld [vmem:[#allocation7 + $0x388] ss:$16 sps:$4 sm:$0xff]   ;;  %v3983_v44 = vld [vmem:[#allocation7 + $0x3a4] ss:$16 sps:$4 sm:$0xff]  }
 0x1f4   :  { %v3986_v45 = vld [vmem:[#allocation7 + $0x3ac] ss:$16 sps:$4 sm:$0xff]   ;;  %v4010_v33 = vld [vmem:[#allocation8 + $0x90] sm:$0xff]  }
 0x1f5   :  { %2502 = vmatprep.mubr.bf16.mxu0 %v1677_v46  ;;  %2588 = vmatprep.mubr.bf16.mxu1 %v1677_v46  ;;  %v3981_v46 = vld [vmem:[#allocation7 + $0x3a0] ss:$16 sps:$4 sm:$0xff]   ;;  %v4011_v35 = vld [vmem:[#allocation8 + $0x58] sm:$0xff]  }
 0x1f6   :  { %2503 = vmatmul.mubr.bf16.vlgmr.msra.gmra.mrb[4].mxu0 %v1676_v49  ;;  %2589 = vmatmul.mubr.bf16.vlgmr.msra.gmra.mrb[4].mxu1 %v1676_v49  ;;  %v3992_v49 = vld [vmem:[#allocation7 + $0x3cc] ss:$16 sps:$4 sm:$0xff]  }
 0x1f7   :  { %2514 = vmatpush1.bf16.msra.mxu0 %v3903_v47  ;;  %2600 = vmatpush1.bf16.msra.mxu1 %v3906_v48  ;;  %v3984_v47 = vld [vmem:[#allocation7 + $0x3a8] ss:$16 sps:$4 sm:$0xff]   ;;  %v3989_v48 = vld [vmem:[#allocation7 + $0x3c4] ss:$16 sps:$4 sm:$0xff]  }
 0x1f8   :  { %2545 = vmatprep.mubr.bf16.mxu0 %v1679_v52  ;;  %2631 = vmatprep.mubr.bf16.mxu1 %v1679_v52  ;;  %v3995_v52 = vld [vmem:[#allocation7 + $0x3e4] ss:$16 sps:$4 sm:$0xff]  }
 0x1f9   :  { %2515 = vmatprep.subr.bf16.mxu0 %v3911_v50  ;;  %2601 = vmatprep.subr.bf16.mxu1 %v3914_v51  ;;  %v3987_v50 = vld [vmem:[#allocation7 + $0x3c0] ss:$16 sps:$4 sm:$0xff]   ;;  %v3990_v51 = vld [vmem:[#allocation7 + $0x3c8] ss:$16 sps:$4 sm:$0xff]  }
 0x1fb   :  { %2516 = vmatpush1.bf16.msra.mxu0 %v3909_v53  ;;  %2602 = vmatpush1.bf16.msra.mxu1 %v3912_v54  ;;  %v3998_v53 = vld [vmem:[#allocation7 + $0x3ec] ss:$16 sps:$4 sm:$0xff]   ;;  %v3993_v54 = vld [vmem:[#allocation7 + $0x3e0] ss:$16 sps:$4 sm:$0xff]  }
 0x1fc   :  { %2517 = vmatprep.subr.bf16.mxu0 %v3917_v55  ;;  %2603 = vmatprep.subr.bf16.mxu1 %v3920_v56  ;;  %v3996_v55 = vld [vmem:[#allocation7 + $0x3e8] ss:$16 sps:$4 sm:$0xff]   ;;  %v3999_v56 = vld [vmem:[#allocation8 + $0x40] sm:$0xff]  }
 0x1ff   :  { %2518 = vmatpush1.bf16.msra.mxu0 %v3915_v57  ;;  %2604 = vmatpush1.bf16.msra.mxu1 %v3918_v58  ;;  %v4000_v57 = vld [vmem:[#allocation8 + $0xc0] sm:$0xff]  }
 0x200   :  { %2519 = vmatprep.subr.bf16.mxu0 %v3923_v59  ;;  %2605 = vmatprep.subr.bf16.mxu1 %v3926_v60  ;;  %v4001_v58 = vld [vmem:[#allocation8] sm:$0xff]   ;;  %v1678_v60 = vmax.bf16 %v4159_v12, %v1674_v43  ;;  %v4012_v43 = vld [vmem:[#allocation8 + $0xd8] sm:$0xff]  }
 0x201   :  { %v4002_v59 = vld [vmem:[#allocation8 + $0x80] sm:$0xff]  }
 0x203   :  { %2520 = vmatpush1.bf16.msra.mxu0 %v3921_v61  ;;  %2606 = vmatpush1.bf16.msra.mxu1 %v3924_v62  ;;  %v4003_v61 = vld [vmem:[#allocation8 + $0x48] sm:$0xff]  }
 0x204   :  { %2521 = vmatprep.subr.bf16.mxu0 %v3929_v63  ;;  %2607 = vmatprep.subr.bf16.mxu1 %v3932_v0  ;;  %v4004_v62 = vld [vmem:[#allocation8 + $0xc8] sm:$0xff]  }
 0x205   :  { %v4005_v63 = vld [vmem:[#allocation8 + $0x8] sm:$0xff]  }
 0x206   :  { %v4006_v0 = vld [vmem:[#allocation8 + $0x88] sm:$0xff]  }
 0x207   :  { %2522 = vmatpush1.bf16.msra.mxu0 %v3927_v1  ;;  %2608 = vmatpush1.bf16.msra.mxu1 %v3930_v2  ;;  %v4007_v1 = vld [vmem:[#allocation8 + $0x50] sm:$0xff]  }
 0x208   :  { %2523 = vmatprep.subr.bf16.mxu0 %v3935_v3  ;;  %2609 = vmatprep.subr.bf16.mxu1 %v3938_v4  ;;  %v4008_v2 = vld [vmem:[#allocation8 + $0xd0] sm:$0xff]   ;;  %v4013_v4 = vld [vmem:[#allocation8 + $0x18] sm:$0xff]  }
 0x209   :  { %v4009_v3 = vld [vmem:[#allocation8 + $0x10] sm:$0xff]  }
 0x20b   :  { %2524 = vmatpush1.bf16.msra.mxu0 %v3933_v5  ;;  %2610 = vmatpush1.bf16.msra.mxu1 %v3936_v6  ;;  %v4014_v5 = vld [vmem:[#allocation8 + $0x98] sm:$0xff]   ;;  %v4015_v6 = vld [vmem:[#allocation8 + $0x60] sm:$0xff]  }
 0x20c   :  { %2525 = vmatprep.subr.bf16.mxu0 %v3941_v7  ;;  %2611 = vmatprep.subr.bf16.mxu1 %v3944_v8  ;;  %v4016_v7 = vld [vmem:[#allocation8 + $0xe0] sm:$0xff]  }
 0x20d   :  { %v4017_v8 = vld [vmem:[#allocation8 + $0x20] sm:$0xff]  }
 0x20f   :  { %2526 = vmatpush1.bf16.msra.mxu0 %v3939_v9  ;;  %2612 = vmatpush1.bf16.msra.mxu1 %v3942_v10  ;;  %v4018_v9 = vld [vmem:[#allocation8 + $0xa0] sm:$0xff]   ;;  %v4019_v10 = vld [vmem:[#allocation8 + $0x68] sm:$0xff]  }
 0x210   :  { %2527 = vmatprep.subr.bf16.mxu0 %v3947_v11  ;;  %2613 = vmatprep.subr.bf16.mxu1 %v3950_v13  ;;  %v4020_v11 = vld [vmem:[#allocation8 + $0xe8] sm:$0xff]  }
 0x211   :  { %v4021_v13 = vld [vmem:[#allocation8 + $0x28] sm:$0xff]  }
 0x213   :  { %2528 = vmatpush1.bf16.msra.mxu0 %v3945_v14  ;;  %2614 = vmatpush1.bf16.msra.mxu1 %v3948_v15  ;;  %v4022_v14 = vld [vmem:[#allocation8 + $0xa8] sm:$0xff]   ;;  %v4023_v15 = vld [vmem:[#allocation8 + $0x70] sm:$0xff]  }
 0x214   :  { %2529 = vmatprep.subr.bf16.mxu0 %v3953_v19  ;;  %2615 = vmatprep.subr.bf16.mxu1 %v3956_v22  ;;  %v4024_v19 = vld [vmem:[#allocation8 + $0xf0] sm:$0xff]  }
 0x215   :  { %v4025_v22 = vld [vmem:[#allocation8 + $0x30] sm:$0xff]  }
 0x217   :  { %2530 = vmatpush1.bf16.msra.mxu0 %v3951_v23  ;;  %2616 = vmatpush1.bf16.msra.mxu1 %v3954_v24  ;;  %v4026_v23 = vld [vmem:[#allocation8 + $0xb0] sm:$0xff]   ;;  %v4027_v24 = vld [vmem:[#allocation8 + $0x78] sm:$0xff]  }
 0x218   :  { %2531 = vmatprep.subr.bf16.mxu0 %v3959_v25  ;;  %2617 = vmatprep.subr.bf16.mxu1 %v3962_v26  ;;  %v4028_v25 = vld [vmem:[#allocation8 + $0xf8] sm:$0xff]  }
 0x219   :  { %v4029_v26 = vld [vmem:[#allocation8 + $0x38] sm:$0xff]  }
 0x21b   :  { %2532 = vmatpush1.bf16.msra.mxu0 %v3957_v27  ;;  %2618 = vmatpush1.bf16.msra.mxu1 %v3960_v28  ;;  %v4030_v27 = vld [vmem:[#allocation8 + $0xb8] sm:$0xff]   ;;  %v1808_v28 = vld [vmem:[%s4334_s4] sm:$0xf] }
 0x21c   :  { %2533 = vmatprep.subr.bf16.mxu0 %v3965_v29  ;;  %2619 = vmatprep.subr.bf16.mxu1 %v3968_v30  ;;  %v1813_v29 = vrot.slane %v1808_v28, %v291_v17  ;;  %v1821_v30 = vrot.slane %v1808_v28, %v299_v18 }
 0x21f   :  { %2534 = vmatpush1.bf16.msra.mxu0 %v3963_v31  ;;  %2620 = vmatpush1.bf16.msra.mxu1 %v3966_v32 }
 0x220   :  { %2535 = vmatprep.subr.bf16.mxu0 %v3971_v34  ;;  %2621 = vmatprep.subr.bf16.mxu1 %v3974_v36  ;;  %v1817_v34 = vrot.slane %v1808_v28, %v295_v20  ;;  %v1825_v36 = vrot.slane %v1808_v28, %v303_v21 }
 0x223   :  { %2536 = vmatpush1.bf16.msra.mxu0 %v3969_v37  ;;  %2622 = vmatpush1.bf16.msra.mxu1 %v3972_v38 }
 0x224   :  { %2537 = vmatprep.subr.bf16.mxu0 %v3977_v39  ;;  %2623 = vmatprep.subr.bf16.mxu1 %v3980_v40 }
 0x227   :  { %2538 = vmatpush1.bf16.msra.mxu0 %v3975_v41  ;;  %2624 = vmatpush1.bf16.msra.mxu1 %v3978_v42 }
 0x228   :  { %2539 = vmatprep.subr.bf16.mxu0 %v3983_v44  ;;  %2625 = vmatprep.subr.bf16.mxu1 %v3986_v45 }
 0x22b   :  { %2540 = vmatpush1.bf16.msra.mxu0 %v3981_v46  ;;  %2626 = vmatpush1.bf16.msra.mxu1 %v3984_v47 }
 0x22c   :  { %2541 = vmatprep.subr.bf16.mxu0 %v3989_v48  ;;  %2627 = vmatprep.subr.bf16.mxu1 %v3992_v49 }
 0x22f   :  { %2542 = vmatpush1.bf16.msra.mxu0 %v3987_v50  ;;  %2628 = vmatpush1.bf16.msra.mxu1 %v3990_v51 }
 0x230   :  { %2543 = vmatprep.subr.bf16.mxu0 %v3995_v52  ;;  %2629 = vmatprep.subr.bf16.mxu1 %v3998_v53 }
 0x233   :  { %2544 = vmatpush1.bf16.msra.mxu0 %v3993_v54  ;;  %2630 = vmatpush1.bf16.msra.mxu1 %v3996_v55 }
 0x234   :  { %3399 = vmatprep.subr.bf16.mxu0 %v3999_v56  ;;  %3421 = vmatprep.subr.bf16.mxu1 %v4000_v57  ;;  %v3357_v57 = vld [vmem:[%s4336_s6] ss:$0 sm:$0xff]  ;;  %s4119_s6 = scalar_lea.vmem %s3011_s9, 128 }
 0x235   :  { %p4120_p4 = scmp.ne.s32.totalorder %s3011_s9, %s4119_s6  ;;  %p4125_p6 = scmp.lt.s32.totalorder %s4119_s6, %s4119_s6 }
 0x236   :  { %2546 = vmatmul.mubr.bf16.vlgmr.msra.gmra.mrb[4].mxu0 %v1678_v60  ;;  %2632 = vmatmul.mubr.bf16.vlgmr.msra.gmra.mrb[4].mxu1 %v1678_v60 }
 0x237   :  { %3400 = vmatpush3.bf16.msra.mxu0 %v4001_v58  ;;  %3422 = vmatpush3.bf16.msra.mxu1 %v4002_v59  ;;  %p4126_p7 = por %p4125_p6, %p4124_p5 }
 0x238   :  { %3401 = vmatprep.subr.bf16.mxu0 %v4003_v61  ;;  %3423 = vmatprep.subr.bf16.mxu1 %v4004_v62 }
 0x239   :  { %p4127_p8 = pnand %p4126_p7, %p4120_p4 }
 0x23b   :  { %3402 = vmatpush3.bf16.msra.mxu0 %v4005_v63  ;;  %3424 = vmatpush3.bf16.msra.mxu1 %v4006_v0 }
 0x23c   :  { %3403 = vmatprep.subr.bf16.mxu0 %v4007_v1  ;;  %3425 = vmatprep.subr.bf16.mxu1 %v4008_v2 }
 0x23f   :  { %3404 = vmatpush3.bf16.msra.mxu0 %v4009_v3  ;;  %3426 = vmatpush3.bf16.msra.mxu1 %v4010_v33 }
 0x240   :  { %3405 = vmatprep.subr.bf16.mxu0 %v4011_v35  ;;  %3427 = vmatprep.subr.bf16.mxu1 %v4012_v43 }
 0x243   :  { %3406 = vmatpush3.bf16.msra.mxu0 %v4013_v4  ;;  %3428 = vmatpush3.bf16.msra.mxu1 %v4014_v5 }
 0x244   :  { %3407 = vmatprep.subr.bf16.mxu0 %v4015_v6  ;;  %3429 = vmatprep.subr.bf16.mxu1 %v4016_v7 }
 0x247   :  { %3408 = vmatpush3.bf16.msra.mxu0 %v4017_v8  ;;  %3430 = vmatpush3.bf16.msra.mxu1 %v4018_v9 }
 0x248   :  { %3409 = vmatprep.subr.bf16.mxu0 %v4019_v10  ;;  %3431 = vmatprep.subr.bf16.mxu1 %v4020_v11 }
 0x24b   :  { %3410 = vmatpush3.bf16.msra.mxu0 %v4021_v13  ;;  %3432 = vmatpush3.bf16.msra.mxu1 %v4022_v14 }
 0x24c   :  { %3411 = vmatprep.subr.bf16.mxu0 %v4023_v15  ;;  %3433 = vmatprep.subr.bf16.mxu1 %v4024_v19 }
 0x24f   :  { %3412 = vmatpush3.bf16.msra.mxu0 %v4025_v22  ;;  %3434 = vmatpush3.bf16.msra.mxu1 %v4026_v23 }
 0x250   :  { %3413 = vmatprep.subr.bf16.mxu0 %v4027_v24  ;;  %3435 = vmatprep.subr.bf16.mxu1 %v4028_v25 }
 0x253   :  { %3414 = vmatpush3.bf16.msra.mxu0 %v4029_v26  ;;  %3436 = vmatpush3.bf16.msra.mxu1 %v4030_v27 }
 0x309   :  { %v2547_v31 = vpop.f32.mrb[4].mxu0  ;;  %v2633_v32 = vpop.f32.mrb[4].mxu1 }
 0x30a   :  { %v2549_v37 = vpop.f32.mrb[5].mxu0  ;;  %v2635_v38 = vpop.f32.mrb[5].mxu1  ;;  %v3451_v41 = vadd.f32 %v2547_v31, %v1813_v29  ;;  %v3455_v42 = vadd.f32 %v2633_v32, %v1821_v30 }
 0x30b   :  { %v2551_v39 = vpop.f32.mrb[6].mxu0  ;;  %v2637_v40 = vpop.f32.mrb[6].mxu1  ;;  %v3452_v47 = vadd.f32 %v2549_v37, %v1817_v34  ;;  %v3456_v18 = vadd.f32 %v2635_v38, %v1825_v36 }
 0x30c   :  { %v3453_v44 = vadd.f32 %v2551_v39, %v1813_v29  ;;  %v3457_v45 = vadd.f32 %v2637_v40, %v1821_v30  ;;  %v2553_v17 = vpop.f32.mrb[7].mxu0  ;;  %v2639_v46 = vpop.f32.mrb[7].mxu1 }
 0x30d   :  { %v3454_v48 = vadd.f32 %v2553_v17, %v1817_v34  ;;  %v3458_v49 = vadd.f32 %v2639_v46, %v1825_v36 }
 0x30e   :  { %v2642_v50 = vpack.c.bf16 %v3453_v44, %v3451_v41  ;;  %v2644_v51 = vpack.c.bf16 %v3457_v45, %v3455_v42 }
 0x30f   :  { %v2643_v20 = vpack.c.bf16 %v3454_v48, %v3452_v47  ;;  %v2645_v52 = vpack.c.bf16 %v3458_v49, %v3456_v18 }
 0x310   :  { %v2646_v53 = vmax.bf16 %v4159_v12, %v2642_v50  ;;  %v2648_v54 = vmax.bf16 %v4159_v12, %v2644_v51 }
 0x311   :  { %v2647_v16 = vmax.bf16 %v4159_v12, %v2643_v20  ;;  %v2649_v21 = vmax.bf16 %v4159_v12, %v2645_v52 }
 0x313   :  { %2945 = vmatprep.mubr.bf16.mxu0 %v2647_v16  ;;  %2986 = vmatprep.mubr.bf16.mxu1 %v2649_v21 }
 0x314   :  { %2946 = vmatmul.mubr.bf16.vlgmr.msra.gmra.mrb[8].mxu0 %v2646_v53  ;;  %2987 = vmatmul.mubr.bf16.vlgmr.msra.gmra.mrb[8].mxu1 %v2648_v54 }
 0x3e7   :  { %v3415_v55 = vpop.f32.mrb[8].mxu0  ;;  %v3437_v56 = vpop.f32.mrb[8].mxu1 }
 0x3e8   :  { %v3416_v58 = vpop.f32.mrb[9].mxu0  ;;  %v3438_v59 = vpop.f32.mrb[9].mxu1 }
 0x3e9   :  { %v3417_v60 = vadd.f32 %v3416_v58, %v3415_v55  ;;  %v3439_v61 = vadd.f32 %v3438_v59, %v3437_v56  ;;  %v3418_v62 = vpop.f32.mrb[10].mxu0  ;;  %v3440_v63 = vpop.f32.mrb[10].mxu1 }
 0x3ea   :  { %v3419_v0 = vpop.f32.mrb[11].mxu0  ;;  %v3441_v1 = vpop.f32.mrb[11].mxu1 }
 0x3eb   :  { %v2948_v2 = vadd.f32 %v3417_v60, %v3357_v57  ;;  %v3420_v12 = vadd.f32 %v3419_v0, %v3418_v62  ;;  %v3442_v3 = vadd.f32 %v3441_v1, %v3440_v63 }
 0x3ed   :  { %v2989_v33 = vadd.f32 %v3439_v61, %v2948_v2  ;;  %v2951_v35 = vadd.f32 %v3420_v12, %v3357_v57 }
 0x3ef   :  { %v2992_v43 = vadd.f32 %v3442_v3, %v2951_v35 }
 0x3f1   :  { %v3397_v4 = vpack.c.bf16 %v2992_v43, %v2989_v33 }
 0x3f3   :  { %3398 = vst [vmem:[#allocation10] sm:$0xff] %v3397_v4  }
 0x3f4   :  { %4130 = shalt.err (!%p4127_p8)
}
 0x3f5   :  { %s4131_s14 = scalar_lea.hbm %s4337_s7, 128 }
 0x3f6   :  { %p4132_p9 = scmp.ne.s32.totalorder %s4337_s7, %s4131_s14  ;;  %p4135_p10 = scmp.lt.u32.totalorder %s4131_s14, %s4337_s7 }
 0x3f8   :  { %p4137_p11 = pnand %p4135_p10, %p4132_p9 }
 0x3fa   :  { %4140 = shalt.err (!%p4137_p11)
}
 0x3fb   :  { %3016 = dma.vmem_to_hbm [thread:$0]  %s3011_s9, 128, %s4337_s7, [#allocation4], %s4157_s3, %s4157_s3, %s4158_s11  }
 0x3fc   :  { %4147 = dma.done.wait [#allocation4], 128  }
 0x3fd   :  { %4148 = vsyncadd [#allocation4], 4294967168 }
 0x3fe   :  { %3020 = vsyncpa [#allocation3], 1 }
 0x3ff   :  { %3021 = vsyncpa [#allocation6], 1 }
 0x400   :  { %3022 = vsyncpa [#allocation9], 1 }
 0x401   :  { %3023 = vsyncpa [#allocation4], 1 }

</bundles_post_ra>
